<compile_context>
chip_gen: v5e
topology: v5e:2x2
jax: 0.10.0
libtpu: 0.0.40
codegen_flags: <defaults>
</compile_context>

<pallas_src>
import functools

import jax
import jax.numpy as jnp
from jax.experimental import pallas as pl
from jax.experimental.pallas import tpu as pltpu


def _round_up(x, m):
    return ((x + m - 1) // m) * m


# ------------------------- fused conv + BN(batch stats) + ReLU kernel -------------------------
def fused_block_kernel(x_ref, w_ref, b_ref, gamma_ref, beta_ref, out_ref,
                       sum_scr, sumsq_scr, scale_scr, shift_scr,
                       *, KH, KW, Ho, Wo, m_img, m_pad, count, eps):
    phase = pl.program_id(0)          # 0: conv + stats, 1: normalize + affine + ReLU
    n = pl.program_id(1)              # image index

    # ------------------------------- phase 0: conv + statistics -------------------------------
    @pl.when(phase == 0)
    def _():
        # 3x3 taps sliced straight from the (1, Hp, Wp, Cin) VMEM block; each tap is reshaped by
        # merging the two leading spatial dims (lane dim Cin untouched) and fed to the MXU as an
        # A @ B^T contraction, accumulating all 9 taps into one f32 (Cout, M) value.
        y = None
        for kh in range(KH):
            for kw in range(KW):
                t = kh * KW + kw
                tap = x_ref[0, kh:kh + Ho, kw:kw + Wo, :]            # (Ho, Wo, Cin)
                tap2d = tap.reshape(Ho * Wo, tap.shape[-1])          # (M, Cin), leading-dim merge
                contrib = jax.lax.dot_general(
                    w_ref[t], tap2d,
                    dimension_numbers=(((1,), (1,)), ((), ())),      # (Cp,Cin) x (M,Cin)^T
                    preferred_element_type=jnp.float32)              # (Cp, M)
                y = contrib if y is None else y + contrib

        conv = y + b_ref[...]                                        # add conv bias, (Cp, M)

        # Resident output block (constant index map) doubles as the conv-activation buffer.
        if m_pad == m_img:
            out_ref[n] = conv
        else:
            out_ref[n] = jnp.pad(conv, ((0, 0), (0, m_pad - m_img)))

        # Bias-pivoted per-channel statistics (y = conv - bias): avoids catastrophic cancellation
        # from a large bias and needs no tail masking (M is exactly Ho*Wo per image).
        @pl.when(n == 0)
        def _():
            sum_scr[...] = jnp.zeros_like(sum_scr)
            sumsq_scr[...] = jnp.zeros_like(sumsq_scr)

        sum_scr[...] += jnp.sum(y, axis=-1, keepdims=True)           # (Cp, 1) lane reduce
        sumsq_scr[...] += jnp.sum(y * y, axis=-1, keepdims=True)

    # --------------------------- phase 1: normalize + affine + ReLU ---------------------------
    @pl.when(phase == 1)
    def _():
        @pl.when(n == 0)
        def _():
            inv_n = 1.0 / count                                      # static Python constant
            mean_y = sum_scr[...] * inv_n                            # mean of (conv - bias)
            var = sumsq_scr[...] * inv_n - mean_y * mean_y           # biased (training-mode BN)
            scale = gamma_ref[...] * jax.lax.rsqrt(var + eps)        # (Cp, 1)
            scale_scr[...] = scale
            shift_scr[...] = beta_ref[...] - (mean_y + b_ref[...]) * scale

        v = out_ref[n]                                               # conv activation, (Cp, Mp)
        out_ref[n] = jnp.maximum(v * scale_scr[...] + shift_scr[...], 0.0)


def block_forward(x_nchw, w_oihw, bias, gamma, beta, *, stride=1, padding=1, eps=1e-5):
    assert stride == 1, "this synthetic Block uses the default stride=1"
    N, Cin, H, W = x_nchw.shape
    Cout, Cin_w, KH, KW = w_oihw.shape
    assert Cin_w == Cin

    Ho = H + 2 * padding - KH + 1
    Wo = W + 2 * padding - KW + 1
    Hp, Wp = H + 2 * padding, W + 2 * padding
    M_img = Ho * Wo
    Mp = _round_up(M_img, 128)            # lane-dense output M axis per image
    Cp = _round_up(Cout, 8)               # sublane-aligned channel axis

    # ---- wrapper glue: ONE input-sized transpose+pad (no 9x im2col materialization) ----
    x_nhwc = jnp.transpose(x_nchw.astype(jnp.float32), (0, 2, 3, 1))          # (N, H, W, Cin)
    xpad = jnp.pad(x_nhwc, ((0, 0), (padding, padding), (padding, padding), (0, 0)))

    # Per-tap weights (KH*KW, Cp, Cin), rows ordered (kh, kw) to match the in-kernel loop.
    w_taps = jnp.transpose(w_oihw.astype(jnp.float32), (2, 3, 0, 1)).reshape(KH * KW, Cout, Cin)
    w_taps = jnp.pad(w_taps, ((0, 0), (0, Cp - Cout), (0, 0)))

    bias_p = jnp.pad(bias.astype(jnp.float32).reshape(Cout, 1), ((0, Cp - Cout), (0, 0)))
    gamma_p = jnp.pad(gamma.astype(jnp.float32).reshape(Cout, 1), ((0, Cp - Cout), (0, 0)))
    beta_p = jnp.pad(beta.astype(jnp.float32).reshape(Cout, 1), ((0, Cp - Cout), (0, 0)))

    # ---- VMEM budget (layout-padded) for the fused resident-activation fast path ----
    cin_lanes = _round_up(Cin, 128)
    est = (N * Cp * Mp * 4                                   # resident output / activation block
           + 2 * Hp * _round_up(Wp, 8) * cin_lanes * 4       # double-buffered input image block
           + KH * KW * Cp * cin_lanes * 4                    # resident per-tap weights
           + (1 << 20))                                      # scratch + slack
    if est > 100 * (1 << 20):
        # TODO(synk): two-pass HBM-spill fallback for activations larger than the VMEM budget.
        raise NotImplementedError("activation does not fit the fused VMEM-resident fast path")
    vmem_limit = int(min(100 * (1 << 20), max(32 * (1 << 20), 2 * est)))

    out_flat = pl.pallas_call(
        functools.partial(fused_block_kernel, KH=KH, KW=KW, Ho=Ho, Wo=Wo,
                          m_img=M_img, m_pad=Mp, count=float(N * M_img), eps=float(eps)),
        grid=(2, N),                                          # (phase, image)
        in_specs=[
            # padded NHWC input; phase 1 does not use it, so pin it to block 0 there
            pl.BlockSpec((1, Hp, Wp, Cin), lambda p, n: (n * (1 - p), 0, 0, 0)),
            pl.BlockSpec((KH * KW, Cp, Cin), lambda p, n: (0, 0, 0)),   # per-tap weights, resident
            pl.BlockSpec((Cp, 1), lambda p, n: (0, 0)),                 # conv bias
            pl.BlockSpec((Cp, 1), lambda p, n: (0, 0)),                 # BN gamma
            pl.BlockSpec((Cp, 1), lambda p, n: (0, 0)),                 # BN beta
        ],
        # Whole output resident in VMEM (constant index map): single HBM writeback at grid end.
        out_specs=pl.BlockSpec((N, Cp, Mp), lambda p, n: (0, 0, 0)),
        out_shape=jax.ShapeDtypeStruct((N, Cp, Mp), jnp.float32),
        scratch_shapes=[
            pltpu.VMEM((Cp, 1), jnp.float32),     # sum of (conv - bias)
            pltpu.VMEM((Cp, 1), jnp.float32),     # sum of squares
            pltpu.VMEM((Cp, 1), jnp.float32),     # BN scale
            pltpu.VMEM((Cp, 1), jnp.float32),     # BN shift
        ],
        compiler_params=pltpu.CompilerParams(
            # Both axes are sequential: stats accumulate across images, phases across the grid.
            dimension_semantics=("arbitrary", "arbitrary"),
            vmem_limit_bytes=vmem_limit),
    )(xpad, w_taps, bias_p, gamma_p, beta_p)

    # (N, Cp, Mp) -> NCHW. With Cout multiple of 8 and Ho*Wo multiple of 128 this is copy-free
    # (no transpose in any case).
    return out_flat[:, :Cout, :M_img].reshape(N, Cout, Ho, Wo)


def block_reference(x_nchw, w_oihw, bias, gamma, beta, *, padding=1, eps=1e-5):
    """Plain-JAX reference mirroring the PyTorch forward (training-mode BN)."""
    conv = jax.lax.conv_general_dilated(
        x_nchw.astype(jnp.float32), w_oihw.astype(jnp.float32),
        window_strides=(1, 1), padding=[(padding, padding), (padding, padding)],
        dimension_numbers=("NCHW", "OIHW", "NCHW"))
    conv = conv + bias.reshape(1, -1, 1, 1)
    mean = jnp.mean(conv, axis=(0, 2, 3), keepdims=True)
    var = jnp.mean((conv - mean) ** 2, axis=(0, 2, 3), keepdims=True)
    y = (conv - mean) * jax.lax.rsqrt(var + eps)
    y = y * gamma.reshape(1, -1, 1, 1) + beta.reshape(1, -1, 1, 1)
    return jnp.maximum(y, 0.0)


if __name__ == "__main__":
    # Small shapes consistent with the module: batch=2, in_channels=4, out_channels=8,
    # spatial=16x16, kernel_size=3, stride=1, padding=1.
    N, Cin, Cout, H, W, K = 2, 4, 8, 16, 16, 3

    key = jax.random.PRNGKey(0)
    kx, kw, kb = jax.random.split(key, 3)
    x = jax.random.normal(kx, (N, Cin, H, W), dtype=jnp.float32)
    conv_w = jax.random.normal(kw, (Cout, Cin, K, K), dtype=jnp.float32) * 0.1
    conv_b = jax.random.normal(kb, (Cout,), dtype=jnp.float32) * 0.1
    bn_gamma = jnp.ones((Cout,), dtype=jnp.float32)     # PyTorch BatchNorm2d default init
    bn_beta = jnp.zeros((Cout,), dtype=jnp.float32)

    out = block_forward(x, conv_w, conv_b, bn_gamma, bn_beta, stride=1, padding=1)
    out = jax.block_until_ready(out)

    ref = block_reference(x, conv_w, conv_b, bn_gamma, bn_beta, padding=1)
    assert out.shape == (N, Cout, H, W), out.shape
    assert jnp.allclose(out, ref, atol=1e-4, rtol=1e-4), float(jnp.max(jnp.abs(out - ref)))

    print("KERNEL_OK")
</pallas_src>

<mosaic_0001>
module attributes {stable_mosaic.version = 11 : i64} {
  func.func @fused_block_kernel(%arg0: i32, %arg1: i32, %arg2: memref<1x18x18x4xf32, #tpu.memory_space<vmem>>, %arg3: memref<9x8x4xf32, #tpu.memory_space<vmem>>, %arg4: memref<8x1xf32, #tpu.memory_space<vmem>>, %arg5: memref<8x1xf32, #tpu.memory_space<vmem>>, %arg6: memref<8x1xf32, #tpu.memory_space<vmem>>, %arg7: memref<2x8x256xf32, #tpu.memory_space<vmem>>, %arg8: memref<8x1xf32, #tpu.memory_space<vmem>>, %arg9: memref<8x1xf32, #tpu.memory_space<vmem>>, %arg10: memref<8x1xf32, #tpu.memory_space<vmem>>, %arg11: memref<8x1xf32, #tpu.memory_space<vmem>>) attributes {dimension_semantics = [#tpu.dimension_semantics<arbitrary>, #tpu.dimension_semantics<arbitrary>], iteration_bounds = array<i64: 2, 2>, scalar_prefetch = 0 : i64, scratch_operands = 4 : i64, tpu.core_type = #tpu.core_type<tc>, window_params = [{transform_indices = @transform_0, window_bounds = array<i64: 1, 18, 18, 4>}, {pipeline_mode = #tpu.pipeline_mode<synchronous>, transform_indices = @transform_1, window_bounds = array<i64: 9, 8, 4>}, {pipeline_mode = #tpu.pipeline_mode<synchronous>, transform_indices = @transform_2, window_bounds = array<i64: 8, 1>}, {pipeline_mode = #tpu.pipeline_mode<synchronous>, transform_indices = @transform_3, window_bounds = array<i64: 8, 1>}, {pipeline_mode = #tpu.pipeline_mode<synchronous>, transform_indices = @transform_4, window_bounds = array<i64: 8, 1>}, {pipeline_mode = #tpu.pipeline_mode<synchronous>, transform_indices = @transform_5, window_bounds = array<i64: 2, 8, 256>}]} {
    %c0_i32 = arith.constant 0 : i32
    %0 = arith.cmpi eq, %arg0, %c0_i32 : i32
    %1 = arith.extui %0 : i1 to i32
    %c0_i32_0 = arith.constant 0 : i32
    %2 = arith.cmpi ne, %1, %c0_i32_0 : i32
    scf.if %2 {
      %c0 = arith.constant 0 : index
      %c0_2 = arith.constant 0 : index
      %c0_3 = arith.constant 0 : index
      %c0_4 = arith.constant 0 : index
      %6 = vector.load %arg2[%c0, %c0_2, %c0_3, %c0_4] : memref<1x18x18x4xf32, #tpu.memory_space<vmem>>, vector<1x16x16x4xf32>
      %7 = vector.shape_cast %6 : vector<1x16x16x4xf32> to vector<16x16x4xf32>
      %8 = vector.shape_cast %7 : vector<16x16x4xf32> to vector<256x4xf32>
      %c0_5 = arith.constant 0 : index
      %c0_6 = arith.constant 0 : index
      %c0_7 = arith.constant 0 : index
      %9 = vector.load %arg3[%c0_5, %c0_6, %c0_7] : memref<9x8x4xf32, #tpu.memory_space<vmem>>, vector<1x8x4xf32>
      %10 = vector.shape_cast %9 : vector<1x8x4xf32> to vector<8x4xf32>
      %cst = arith.constant dense<0.000000e+00> : vector<8x256xf32>
      %11 = tpu.matmul %10, %8, %cst {dimension_numbers = #tpu.dot_dimension_numbers<[1], [1], [0], [0], [0, 0, 1, 0], [], []>} : vector<8x4xf32>, vector<256x4xf32>, vector<8x256xf32> -> vector<8x256xf32>
      %c0_8 = arith.constant 0 : index
      %c0_9 = arith.constant 0 : index
      %c1 = arith.constant 1 : index
      %c0_10 = arith.constant 0 : index
      %12 = vector.load %arg2[%c0_8, %c0_9, %c1, %c0_10] : memref<1x18x18x4xf32, #tpu.memory_space<vmem>>, vector<1x16x16x4xf32>
      %13 = vector.shape_cast %12 : vector<1x16x16x4xf32> to vector<16x16x4xf32>
      %14 = vector.shape_cast %13 : vector<16x16x4xf32> to vector<256x4xf32>
      %c1_11 = arith.constant 1 : index
      %c0_12 = arith.constant 0 : index
      %c0_13 = arith.constant 0 : index
      %15 = vector.load %arg3[%c1_11, %c0_12, %c0_13] : memref<9x8x4xf32, #tpu.memory_space<vmem>>, vector<1x8x4xf32>
      %16 = vector.shape_cast %15 : vector<1x8x4xf32> to vector<8x4xf32>
      %cst_14 = arith.constant dense<0.000000e+00> : vector<8x256xf32>
      %17 = tpu.matmul %16, %14, %cst_14 {dimension_numbers = #tpu.dot_dimension_numbers<[1], [1], [0], [0], [0, 0, 1, 0], [], []>} : vector<8x4xf32>, vector<256x4xf32>, vector<8x256xf32> -> vector<8x256xf32>
      %18 = arith.addf %11, %17 : vector<8x256xf32>
      %c0_15 = arith.constant 0 : index
      %c0_16 = arith.constant 0 : index
      %c2 = arith.constant 2 : index
      %c0_17 = arith.constant 0 : index
      %19 = vector.load %arg2[%c0_15, %c0_16, %c2, %c0_17] : memref<1x18x18x4xf32, #tpu.memory_space<vmem>>, vector<1x16x16x4xf32>
      %20 = vector.shape_cast %19 : vector<1x16x16x4xf32> to vector<16x16x4xf32>
      %21 = vector.shape_cast %20 : vector<16x16x4xf32> to vector<256x4xf32>
      %c2_18 = arith.constant 2 : index
      %c0_19 = arith.constant 0 : index
      %c0_20 = arith.constant 0 : index
      %22 = vector.load %arg3[%c2_18, %c0_19, %c0_20] : memref<9x8x4xf32, #tpu.memory_space<vmem>>, vector<1x8x4xf32>
      %23 = vector.shape_cast %22 : vector<1x8x4xf32> to vector<8x4xf32>
      %cst_21 = arith.constant dense<0.000000e+00> : vector<8x256xf32>
      %24 = tpu.matmul %23, %21, %cst_21 {dimension_numbers = #tpu.dot_dimension_numbers<[1], [1], [0], [0], [0, 0, 1, 0], [], []>} : vector<8x4xf32>, vector<256x4xf32>, vector<8x256xf32> -> vector<8x256xf32>
      %25 = arith.addf %18, %24 : vector<8x256xf32>
      %c0_22 = arith.constant 0 : index
      %c1_23 = arith.constant 1 : index
      %c0_24 = arith.constant 0 : index
      %c0_25 = arith.constant 0 : index
      %26 = vector.load %arg2[%c0_22, %c1_23, %c0_24, %c0_25] : memref<1x18x18x4xf32, #tpu.memory_space<vmem>>, vector<1x16x16x4xf32>
      %27 = vector.shape_cast %26 : vector<1x16x16x4xf32> to vector<16x16x4xf32>
      %28 = vector.shape_cast %27 : vector<16x16x4xf32> to vector<256x4xf32>
      %c3 = arith.constant 3 : index
      %c0_26 = arith.constant 0 : index
      %c0_27 = arith.constant 0 : index
      %29 = vector.load %arg3[%c3, %c0_26, %c0_27] : memref<9x8x4xf32, #tpu.memory_space<vmem>>, vector<1x8x4xf32>
      %30 = vector.shape_cast %29 : vector<1x8x4xf32> to vector<8x4xf32>
      %cst_28 = arith.constant dense<0.000000e+00> : vector<8x256xf32>
      %31 = tpu.matmul %30, %28, %cst_28 {dimension_numbers = #tpu.dot_dimension_numbers<[1], [1], [0], [0], [0, 0, 1, 0], [], []>} : vector<8x4xf32>, vector<256x4xf32>, vector<8x256xf32> -> vector<8x256xf32>
      %32 = arith.addf %25, %31 : vector<8x256xf32>
      %c0_29 = arith.constant 0 : index
      %c1_30 = arith.constant 1 : index
      %c1_31 = arith.constant 1 : index
      %c0_32 = arith.constant 0 : index
      %33 = vector.load %arg2[%c0_29, %c1_30, %c1_31, %c0_32] : memref<1x18x18x4xf32, #tpu.memory_space<vmem>>, vector<1x16x16x4xf32>
      %34 = vector.shape_cast %33 : vector<1x16x16x4xf32> to vector<16x16x4xf32>
      %35 = vector.shape_cast %34 : vector<16x16x4xf32> to vector<256x4xf32>
      %c4 = arith.constant 4 : index
      %c0_33 = arith.constant 0 : index
      %c0_34 = arith.constant 0 : index
      %36 = vector.load %arg3[%c4, %c0_33, %c0_34] : memref<9x8x4xf32, #tpu.memory_space<vmem>>, vector<1x8x4xf32>
      %37 = vector.shape_cast %36 : vector<1x8x4xf32> to vector<8x4xf32>
      %cst_35 = arith.constant dense<0.000000e+00> : vector<8x256xf32>
      %38 = tpu.matmul %37, %35, %cst_35 {dimension_numbers = #tpu.dot_dimension_numbers<[1], [1], [0], [0], [0, 0, 1, 0], [], []>} : vector<8x4xf32>, vector<256x4xf32>, vector<8x256xf32> -> vector<8x256xf32>
      %39 = arith.addf %32, %38 : vector<8x256xf32>
      %c0_36 = arith.constant 0 : index
      %c1_37 = arith.constant 1 : index
      %c2_38 = arith.constant 2 : index
      %c0_39 = arith.constant 0 : index
      %40 = vector.load %arg2[%c0_36, %c1_37, %c2_38, %c0_39] : memref<1x18x18x4xf32, #tpu.memory_space<vmem>>, vector<1x16x16x4xf32>
      %41 = vector.shape_cast %40 : vector<1x16x16x4xf32> to vector<16x16x4xf32>
      %42 = vector.shape_cast %41 : vector<16x16x4xf32> to vector<256x4xf32>
      %c5 = arith.constant 5 : index
      %c0_40 = arith.constant 0 : index
      %c0_41 = arith.constant 0 : index
      %43 = vector.load %arg3[%c5, %c0_40, %c0_41] : memref<9x8x4xf32, #tpu.memory_space<vmem>>, vector<1x8x4xf32>
      %44 = vector.shape_cast %43 : vector<1x8x4xf32> to vector<8x4xf32>
      %cst_42 = arith.constant dense<0.000000e+00> : vector<8x256xf32>
      %45 = tpu.matmul %44, %42, %cst_42 {dimension_numbers = #tpu.dot_dimension_numbers<[1], [1], [0], [0], [0, 0, 1, 0], [], []>} : vector<8x4xf32>, vector<256x4xf32>, vector<8x256xf32> -> vector<8x256xf32>
      %46 = arith.addf %39, %45 : vector<8x256xf32>
      %c0_43 = arith.constant 0 : index
      %c2_44 = arith.constant 2 : index
      %c0_45 = arith.constant 0 : index
      %c0_46 = arith.constant 0 : index
      %47 = vector.load %arg2[%c0_43, %c2_44, %c0_45, %c0_46] : memref<1x18x18x4xf32, #tpu.memory_space<vmem>>, vector<1x16x16x4xf32>
      %48 = vector.shape_cast %47 : vector<1x16x16x4xf32> to vector<16x16x4xf32>
      %49 = vector.shape_cast %48 : vector<16x16x4xf32> to vector<256x4xf32>
      %c6 = arith.constant 6 : index
      %c0_47 = arith.constant 0 : index
      %c0_48 = arith.constant 0 : index
      %50 = vector.load %arg3[%c6, %c0_47, %c0_48] : memref<9x8x4xf32, #tpu.memory_space<vmem>>, vector<1x8x4xf32>
      %51 = vector.shape_cast %50 : vector<1x8x4xf32> to vector<8x4xf32>
      %cst_49 = arith.constant dense<0.000000e+00> : vector<8x256xf32>
      %52 = tpu.matmul %51, %49, %cst_49 {dimension_numbers = #tpu.dot_dimension_numbers<[1], [1], [0], [0], [0, 0, 1, 0], [], []>} : vector<8x4xf32>, vector<256x4xf32>, vector<8x256xf32> -> vector<8x256xf32>
      %53 = arith.addf %46, %52 : vector<8x256xf32>
      %c0_50 = arith.constant 0 : index
      %c2_51 = arith.constant 2 : index
      %c1_52 = arith.constant 1 : index
      %c0_53 = arith.constant 0 : index
      %54 = vector.load %arg2[%c0_50, %c2_51, %c1_52, %c0_53] : memref<1x18x18x4xf32, #tpu.memory_space<vmem>>, vector<1x16x16x4xf32>
      %55 = vector.shape_cast %54 : vector<1x16x16x4xf32> to vector<16x16x4xf32>
      %56 = vector.shape_cast %55 : vector<16x16x4xf32> to vector<256x4xf32>
      %c7 = arith.constant 7 : index
      %c0_54 = arith.constant 0 : index
      %c0_55 = arith.constant 0 : index
      %57 = vector.load %arg3[%c7, %c0_54, %c0_55] : memref<9x8x4xf32, #tpu.memory_space<vmem>>, vector<1x8x4xf32>
      %58 = vector.shape_cast %57 : vector<1x8x4xf32> to vector<8x4xf32>
      %cst_56 = arith.constant dense<0.000000e+00> : vector<8x256xf32>
      %59 = tpu.matmul %58, %56, %cst_56 {dimension_numbers = #tpu.dot_dimension_numbers<[1], [1], [0], [0], [0, 0, 1, 0], [], []>} : vector<8x4xf32>, vector<256x4xf32>, vector<8x256xf32> -> vector<8x256xf32>
      %60 = arith.addf %53, %59 : vector<8x256xf32>
      %c0_57 = arith.constant 0 : index
      %c2_58 = arith.constant 2 : index
      %c2_59 = arith.constant 2 : index
      %c0_60 = arith.constant 0 : index
      %61 = vector.load %arg2[%c0_57, %c2_58, %c2_59, %c0_60] : memref<1x18x18x4xf32, #tpu.memory_space<vmem>>, vector<1x16x16x4xf32>
      %62 = vector.shape_cast %61 : vector<1x16x16x4xf32> to vector<16x16x4xf32>
      %63 = vector.shape_cast %62 : vector<16x16x4xf32> to vector<256x4xf32>
      %c8 = arith.constant 8 : index
      %c0_61 = arith.constant 0 : index
      %c0_62 = arith.constant 0 : index
      %64 = vector.load %arg3[%c8, %c0_61, %c0_62] : memref<9x8x4xf32, #tpu.memory_space<vmem>>, vector<1x8x4xf32>
      %65 = vector.shape_cast %64 : vector<1x8x4xf32> to vector<8x4xf32>
      %cst_63 = arith.constant dense<0.000000e+00> : vector<8x256xf32>
      %66 = tpu.matmul %65, %63, %cst_63 {dimension_numbers = #tpu.dot_dimension_numbers<[1], [1], [0], [0], [0, 0, 1, 0], [], []>} : vector<8x4xf32>, vector<256x4xf32>, vector<8x256xf32> -> vector<8x256xf32>
      %67 = arith.addf %60, %66 : vector<8x256xf32>
      %c0_64 = arith.constant 0 : index
      %c0_65 = arith.constant 0 : index
      %68 = vector.load %arg4[%c0_64, %c0_65] : memref<8x1xf32, #tpu.memory_space<vmem>>, vector<8x1xf32>
      %69 = vector.broadcast %68 : vector<8x1xf32> to vector<8x256xf32>
      %70 = arith.addf %67, %69 : vector<8x256xf32>
      %71 = arith.index_cast %arg1 : i32 to index
      %c0_66 = arith.constant 0 : index
      %c0_67 = arith.constant 0 : index
      %72 = vector.load %arg7[%71, %c0_66, %c0_67] : memref<2x8x256xf32, #tpu.memory_space<vmem>>, vector<1x8x256xf32>
      %73 = vector.shape_cast %72 : vector<1x8x256xf32> to vector<8x256xf32>
      %74 = vector.shape_cast %70 : vector<8x256xf32> to vector<1x8x256xf32>
      tpu.vector_store %arg7[%71, %c0_66, %c0_67], %74 {strides = array<i32>} : memref<2x8x256xf32, #tpu.memory_space<vmem>>, vector<1x8x256xf32>,
      %c0_i32_68 = arith.constant 0 : i32
      %75 = arith.cmpi eq, %arg1, %c0_i32_68 : i32
      %76 = arith.extui %75 : i1 to i32
      %c0_i32_69 = arith.constant 0 : i32
      %77 = arith.cmpi ne, %76, %c0_i32_69 : i32
      scf.if %77 {
        %cst_80 = arith.constant 0.000000e+00 : f32
        %89 = vector.broadcast %cst_80 : f32 to vector<8x1xf32>
        %c0_81 = arith.constant 0 : index
        %c0_82 = arith.constant 0 : index
        %90 = vector.load %arg8[%c0_81, %c0_82] : memref<8x1xf32, #tpu.memory_space<vmem>>, vector<8x1xf32>
        tpu.vector_store %arg8[%c0_81, %c0_82], %89 {strides = array<i32>} : memref<8x1xf32, #tpu.memory_space<vmem>>, vector<8x1xf32>,
        %cst_83 = arith.constant 0.000000e+00 : f32
        %91 = vector.broadcast %cst_83 : f32 to vector<8x1xf32>
        %c0_84 = arith.constant 0 : index
        %c0_85 = arith.constant 0 : index
        %92 = vector.load %arg9[%c0_84, %c0_85] : memref<8x1xf32, #tpu.memory_space<vmem>>, vector<8x1xf32>
        tpu.vector_store %arg9[%c0_84, %c0_85], %91 {strides = array<i32>} : memref<8x1xf32, #tpu.memory_space<vmem>>, vector<8x1xf32>,
      } else {
      }
      %c0_70 = arith.constant 0 : index
      %c0_71 = arith.constant 0 : index
      %78 = vector.load %arg8[%c0_70, %c0_71] : memref<8x1xf32, #tpu.memory_space<vmem>>, vector<8x1xf32>
      %cst_72 = arith.constant dense<0.000000e+00> : vector<8xf32>
      %79 = vector.multi_reduction <add>, %67, %cst_72 [1] : vector<8x256xf32> to vector<8xf32>
      %80 = vector.shape_cast %79 : vector<8xf32> to vector<8x1xf32>
      %81 = arith.addf %78, %80 : vector<8x1xf32>
      %c0_73 = arith.constant 0 : index
      %c0_74 = arith.constant 0 : index
      %82 = vector.load %arg8[%c0_73, %c0_74] : memref<8x1xf32, #tpu.memory_space<vmem>>, vector<8x1xf32>
      tpu.vector_store %arg8[%c0_73, %c0_74], %81 {strides = array<i32>} : memref<8x1xf32, #tpu.memory_space<vmem>>, vector<8x1xf32>,
      %c0_75 = arith.constant 0 : index
      %c0_76 = arith.constant 0 : index
      %83 = vector.load %arg9[%c0_75, %c0_76] : memref<8x1xf32, #tpu.memory_space<vmem>>, vector<8x1xf32>
      %84 = arith.mulf %67, %67 : vector<8x256xf32>
      %cst_77 = arith.constant dense<0.000000e+00> : vector<8xf32>
      %85 = vector.multi_reduction <add>, %84, %cst_77 [1] : vector<8x256xf32> to vector<8xf32>
      %86 = vector.shape_cast %85 : vector<8xf32> to vector<8x1xf32>
      %87 = arith.addf %83, %86 : vector<8x1xf32>
      %c0_78 = arith.constant 0 : index
      %c0_79 = arith.constant 0 : index
      %88 = vector.load %arg9[%c0_78, %c0_79] : memref<8x1xf32, #tpu.memory_space<vmem>>, vector<8x1xf32>
      tpu.vector_store %arg9[%c0_78, %c0_79], %87 {strides = array<i32>} : memref<8x1xf32, #tpu.memory_space<vmem>>, vector<8x1xf32>,
    } else {
    }
    %c1_i32 = arith.constant 1 : i32
    %3 = arith.cmpi eq, %arg0, %c1_i32 : i32
    %4 = arith.extui %3 : i1 to i32
    %c0_i32_1 = arith.constant 0 : i32
    %5 = arith.cmpi ne, %4, %c0_i32_1 : i32
    scf.if %5 {
      %c0_i32_2 = arith.constant 0 : i32
      %6 = arith.cmpi eq, %arg1, %c0_i32_2 : i32
      %7 = arith.extui %6 : i1 to i32
      %c0_i32_3 = arith.constant 0 : i32
      %8 = arith.cmpi ne, %7, %c0_i32_3 : i32
      scf.if %8 {
        %c0_11 = arith.constant 0 : index
        %c0_12 = arith.constant 0 : index
        %24 = vector.load %arg8[%c0_11, %c0_12] : memref<8x1xf32, #tpu.memory_space<vmem>>, vector<8x1xf32>
        %cst_13 = arith.constant 0.001953125 : f32
        %25 = vector.broadcast %cst_13 : f32 to vector<8x1xf32>
        %26 = arith.mulf %24, %25 : vector<8x1xf32>
        %c0_14 = arith.constant 0 : index
        %c0_15 = arith.constant 0 : index
        %27 = vector.load %arg9[%c0_14, %c0_15] : memref<8x1xf32, #tpu.memory_space<vmem>>, vector<8x1xf32>
        %cst_16 = arith.constant 0.001953125 : f32
        %28 = vector.broadcast %cst_16 : f32 to vector<8x1xf32>
        %29 = arith.mulf %27, %28 : vector<8x1xf32>
        %30 = arith.mulf %26, %26 : vector<8x1xf32>
        %31 = arith.subf %29, %30 : vector<8x1xf32>
        %c0_17 = arith.constant 0 : index
        %c0_18 = arith.constant 0 : index
        %32 = vector.load %arg5[%c0_17, %c0_18] : memref<8x1xf32, #tpu.memory_space<vmem>>, vector<8x1xf32>
        %cst_19 = arith.constant 9.99999974E-6 : f32
        %33 = vector.broadcast %cst_19 : f32 to vector<8x1xf32>
        %34 = arith.addf %31, %33 : vector<8x1xf32>
        %35 = math.rsqrt %34 : vector<8x1xf32>
        %36 = arith.mulf %32, %35 : vector<8x1xf32>
        %c0_20 = arith.constant 0 : index
        %c0_21 = arith.constant 0 : index
        %37 = vector.load %arg10[%c0_20, %c0_21] : memref<8x1xf32, #tpu.memory_space<vmem>>, vector<8x1xf32>
        tpu.vector_store %arg10[%c0_20, %c0_21], %36 {strides = array<i32>} : memref<8x1xf32, #tpu.memory_space<vmem>>, vector<8x1xf32>,
        %c0_22 = arith.constant 0 : index
        %c0_23 = arith.constant 0 : index
        %38 = vector.load %arg6[%c0_22, %c0_23] : memref<8x1xf32, #tpu.memory_space<vmem>>, vector<8x1xf32>
        %c0_24 = arith.constant 0 : index
        %c0_25 = arith.constant 0 : index
        %39 = vector.load %arg4[%c0_24, %c0_25] : memref<8x1xf32, #tpu.memory_space<vmem>>, vector<8x1xf32>
        %40 = arith.addf %26, %39 : vector<8x1xf32>
        %41 = arith.mulf %40, %36 : vector<8x1xf32>
        %42 = arith.subf %38, %41 : vector<8x1xf32>
        %c0_26 = arith.constant 0 : index
        %c0_27 = arith.constant 0 : index
        %43 = vector.load %arg11[%c0_26, %c0_27] : memref<8x1xf32, #tpu.memory_space<vmem>>, vector<8x1xf32>
        tpu.vector_store %arg11[%c0_26, %c0_27], %42 {strides = array<i32>} : memref<8x1xf32, #tpu.memory_space<vmem>>, vector<8x1xf32>,
      } else {
      }
      %9 = arith.index_cast %arg1 : i32 to index
      %c0 = arith.constant 0 : index
      %c0_4 = arith.constant 0 : index
      %10 = vector.load %arg7[%9, %c0, %c0_4] : memref<2x8x256xf32, #tpu.memory_space<vmem>>, vector<1x8x256xf32>
      %11 = vector.shape_cast %10 : vector<1x8x256xf32> to vector<8x256xf32>
      %c0_5 = arith.constant 0 : index
      %c0_6 = arith.constant 0 : index
      %12 = vector.load %arg10[%c0_5, %c0_6] : memref<8x1xf32, #tpu.memory_space<vmem>>, vector<8x1xf32>
      %13 = vector.broadcast %12 : vector<8x1xf32> to vector<8x256xf32>
      %14 = arith.mulf %11, %13 : vector<8x256xf32>
      %c0_7 = arith.constant 0 : index
      %c0_8 = arith.constant 0 : index
      %15 = vector.load %arg11[%c0_7, %c0_8] : memref<8x1xf32, #tpu.memory_space<vmem>>, vector<8x1xf32>
      %16 = vector.broadcast %15 : vector<8x1xf32> to vector<8x256xf32>
      %17 = arith.addf %14, %16 : vector<8x256xf32>
      %cst = arith.constant 0.000000e+00 : f32
      %18 = vector.broadcast %cst : f32 to vector<8x256xf32>
      %19 = arith.maximumf %17, %18 : vector<8x256xf32>
      %20 = arith.index_cast %arg1 : i32 to index
      %c0_9 = arith.constant 0 : index
      %c0_10 = arith.constant 0 : index
      %21 = vector.load %arg7[%20, %c0_9, %c0_10] : memref<2x8x256xf32, #tpu.memory_space<vmem>>, vector<1x8x256xf32>
      %22 = vector.shape_cast %21 : vector<1x8x256xf32> to vector<8x256xf32>
      %23 = vector.shape_cast %19 : vector<8x256xf32> to vector<1x8x256xf32>
      tpu.vector_store %arg7[%20, %c0_9, %c0_10], %23 {strides = array<i32>} : memref<2x8x256xf32, #tpu.memory_space<vmem>>, vector<1x8x256xf32>,
    } else {
    }
    return
  }
  func.func @transform_0(%arg0: i32, %arg1: i32) -> (i32, i32, i32, i32) {
    %c1_i32 = arith.constant 1 : i32
    %0 = arith.subi %c1_i32, %arg0 : i32
    %1 = arith.muli %arg1, %0 : i32
    %c0_i32 = arith.constant 0 : i32
    %c0_i32_0 = arith.constant 0 : i32
    %c0_i32_1 = arith.constant 0 : i32
    %c0_i32_2 = arith.constant 0 : i32
    return %1, %c0_i32, %c0_i32_0, %c0_i32_1 : i32, i32, i32, i32
  }
  func.func @transform_1(%arg0: i32, %arg1: i32) -> (i32, i32, i32) {
    %c0_i32 = arith.constant 0 : i32
    %c0_i32_0 = arith.constant 0 : i32
    %c0_i32_1 = arith.constant 0 : i32
    %c0_i32_2 = arith.constant 0 : i32
    return %c0_i32, %c0_i32_0, %c0_i32_1 : i32, i32, i32
  }
  func.func @transform_2(%arg0: i32, %arg1: i32) -> (i32, i32) {
    %c0_i32 = arith.constant 0 : i32
    %c0_i32_0 = arith.constant 0 : i32
    %c0_i32_1 = arith.constant 0 : i32
    return %c0_i32, %c0_i32_0 : i32, i32
  }
  func.func @transform_3(%arg0: i32, %arg1: i32) -> (i32, i32) {
    %c0_i32 = arith.constant 0 : i32
    %c0_i32_0 = arith.constant 0 : i32
    %c0_i32_1 = arith.constant 0 : i32
    return %c0_i32, %c0_i32_0 : i32, i32
  }
  func.func @transform_4(%arg0: i32, %arg1: i32) -> (i32, i32) {
    %c0_i32 = arith.constant 0 : i32
    %c0_i32_0 = arith.constant 0 : i32
    %c0_i32_1 = arith.constant 0 : i32
    return %c0_i32, %c0_i32_0 : i32, i32
  }
  func.func @transform_5(%arg0: i32, %arg1: i32) -> (i32, i32, i32) {
    %c0_i32 = arith.constant 0 : i32
    %c0_i32_0 = arith.constant 0 : i32
    %c0_i32_1 = arith.constant 0 : i32
    %c0_i32_2 = arith.constant 0 : i32
    return %c0_i32, %c0_i32_0, %c0_i32_1 : i32, i32, i32
  }
}

</mosaic_0001>

<bundles_post_ra>
// kernel: tpu_custom_call.1
= control target key start
LH: loop header
LB: loop body
LE: loop exit
PB: predicated region body
PF: predicated region fallthrough
CT: control target
= control target key end

     0   :  { %10 = vsyncpa [#allocation7], 0  ;;  %s2665_s18 = smov 0   ;;  %s2667_s19 = smov 0   ;;  %s3654_s0 = inlined_call_operand.vmem [shape: f32[2,18,18,4], index: 0, kind: input, shape index: {}]   ;;  %s3655_s1 = inlined_call_operand.vmem [shape: f32[9,8,4], index: 1, kind: input, shape index: {}]   ;;  %s3656_s2 = inlined_call_operand.vmem [shape: f32[8,1], index: 2, kind: input, shape index: {}]   ;;  %s3657_s3 = inlined_call_operand.vmem [shape: f32[8,1], index: 3, kind: input, shape index: {}]   ;;  %s3658_s4 = inlined_call_operand.vmem [shape: f32[8,1], index: 4, kind: input, shape index: {}]   ;;  %s3659_s5 = inlined_call_operand.hbm [shape: f32[2,8,256], index: 5, kind: output, shape index: {}]  }
   0x1   :  { %s2669_s20 = smov 0   ;;  %s2671_s21 = smov 0  }
   0x2   :  { %s2673_s22 = smov 0  }
   0x3 LB: > { %s1975_s23 = sadd.s32 4294967295, %s2627_s22   ;;  %s25_s24 = sadd.s32 1, %s2619_s20  ;;  %s2627_s22 = sphi %s2673_s22, %s16_s22   ;;  %s2623_s21 = sphi %s2671_s21, %s3773_s21   ;;  %s2619_s20 = sphi %s2669_s20, %s3772_s20   ;;  %s2615_s19 = sphi %s2667_s19, %s3771_s19   ;;  %s2611_s18 = sphi %s2665_s18, %s3770_s18  }
   0x4   : > { %p26_p0 = scmp.ge.s32.totalorder %s25_s24, 2  ;;  %s28_s25 = sadd.s32 1, %s2623_s21 }
   0x5   : > { %p1978_p1 = scmp.ge.s32.totalorder %s2627_s22, 1  ;;  %p203_p2 = scmp.lt.s32.totalorder %s2627_s22, 5 }
   0x6   : > { %s3775_s24 = smov (%p26_p0, %s25_s24), 0  ;;  %s3777_s25 = smov (!%p26_p0, %s28_s25), %s2623_s21 }
   0x7   : > { %p204_p3 = pnand %p1978_p1, %p203_p2  ;;  %p30_p4 = scmp.ge.s32.totalorder %s3777_s25, 2 }
   0x8   : > { %s228_s26 = ssub.s32 (!%p204_p3), 1, %s2615_s19  ;;  %p1980_p6 = scmp.ne.s32.totalorder (!%p204_p3), %s2615_s19, 0 }
   0x9   : > { %s3779_s25 = smov (%p30_p4, %s3777_s25), 0  ;;  %207 = sbr.rel (%p204_p3) target bundleno = 787 (0x313), region = 40 }
   0xa   : > { %s229_s27 = smul.u32 (!%p204_p3), %s2611_s18, %s228_s26 }
   0xc   : > { %p230_p5 = scmp.lt.s32.totalorder (!%p204_p3), %s229_s27, 1 }
   0xe   : > { %s3781_s27 = smov (!%p230_p5, %s229_s27), 1  ;;  %240 = sbr.rel (%p1980_p6) target bundleno = 603 (0x25b), region = 44 }
   0xf   : > { %s2500_s28 = smul.u32 432, %s3781_s27 }
  0x11   : > { %s2705_s6 = scalar_lea.vmem %s3654_s0, %s2500_s28 }
  0x13   : > { %v2709_v0 = vld [vmem:[%s2705_s6 + $0xb1] sm:$0xff]  ;;  %vm308_vm0 = vcmask 31744   ;;  %v2729_v4 = vld [vmem:[%s2705_s6 + $0xa9] sm:$0xff]  ;;  %v2749_v8 = vld [vmem:[%s2705_s6 + $0x99] sm:$0xff]  ;;  %s2498_s10 = sshll.u32 %s2611_s18, 4  ;;  %p2489_p7 = scmp.ne.s32.totalorder %s2611_s18, 0 }
  0x14   : > { %v2712_v1 = vld [vmem:[%s2705_s6 + $0x171] sm:$0xff]  ;;  %1982 = vmatpush.xpose.msk.msra.mxu0 %vm308_vm0, %v2709_v0  ;;  %v2732_v5 = vld [vmem:[%s2705_s6 + $0x169] sm:$0xff]  ;;  %v2752_v9 = vld [vmem:[%s2705_s6 + $0x159] sm:$0xff]  ;;  %s1824_s11 = scalar_lea.vmem [#allocation6], %s2498_s10 }
  0x15   : > { %v2715_v2 = vld [vmem:[%s2705_s6 + $0xb0] sm:$0xff]  ;;  %1999 = vmatpush.xpose.msk.msra.mxu1 %vm308_vm0, %v2712_v1  ;;  %v2735_v6 = vld [vmem:[%s2705_s6 + $0xa8] sm:$0xff]  ;;  %v2755_v10 = vld [vmem:[%s2705_s6 + $0x98] sm:$0xff] }
  0x16   : > { %3698 = vst [vmem:[#allocation9_spill] sm:$0xff] %v2715_v2  ;;  %v2722_v3 = vld [vmem:[%s2705_s6 + $0x170] sm:$0xff]  ;;  %2016 = vmatpush.xpose.msk.msra.mxu2 %vm308_vm0, %v2715_v2  ;;  %v2738_v7 = vld [vmem:[%s2705_s6 + $0x168] sm:$0xff]  ;;  %v2758_v11 = vld [vmem:[%s2705_s6 + $0x158] sm:$0xff] }
  0x17   : > { %3699 = vst [vmem:[#allocation10_spill] sm:$0xff] %v2722_v3  ;;  %2033 = vmatpush.xpose.msk.msra.mxu3 %vm308_vm0, %v2722_v3  ;;  %v2769_v12 = vld [vmem:[%s2705_s6 + $0x91] sm:$0xff]  ;;  %v2789_v16 = vld [vmem:[%s2705_s6 + $0x81] sm:$0xff]  ;;  %v2809_v20 = vld [vmem:[%s2705_s6 + $0x79] sm:$0xff] }
  0x18   : > { %3700 = vst [vmem:[#allocation11_spill] sm:$0xff] %v2735_v6  ;;  %1983 = vmatpush.xpose.msk.msra.mxu0 %vm308_vm0, %v2729_v4  ;;  %v2772_v13 = vld [vmem:[%s2705_s6 + $0x151] sm:$0xff]  ;;  %v2792_v17 = vld [vmem:[%s2705_s6 + $0x141] sm:$0xff]  ;;  %v2812_v21 = vld [vmem:[%s2705_s6 + $0x139] sm:$0xff] }
  0x19   : > { %3701 = vst [vmem:[#allocation12_spill] sm:$0xff] %v2738_v7  ;;  %2000 = vmatpush.xpose.msk.msra.mxu1 %vm308_vm0, %v2732_v5  ;;  %v2775_v14 = vld [vmem:[%s2705_s6 + $0x90] sm:$0xff]  ;;  %v2795_v18 = vld [vmem:[%s2705_s6 + $0x80] sm:$0xff]  ;;  %v2815_v22 = vld [vmem:[%s2705_s6 + $0x78] sm:$0xff] }
  0x1a   : > { %2017 = vmatpush.xpose.msk.msra.mxu2 %vm308_vm0, %v2735_v6  ;;  %3702 = vst [vmem:[#allocation13_spill] sm:$0xff] %v2755_v10  ;;  %v2778_v15 = vld [vmem:[%s2705_s6 + $0x150] sm:$0xff]  ;;  %v2798_v19 = vld [vmem:[%s2705_s6 + $0x140] sm:$0xff]  ;;  %v2818_v23 = vld [vmem:[%s2705_s6 + $0x138] sm:$0xff] }
  0x1b   : > { %2034 = vmatpush.xpose.msk.msra.mxu3 %vm308_vm0, %v2738_v7  ;;  %3703 = vst [vmem:[#allocation14_spill] sm:$0xff] %v2758_v11  ;;  %v2829_v24 = vld [vmem:[%s2705_s6 + $0x69] sm:$0xff]  ;;  %v2849_v28 = vld [vmem:[%s2705_s6 + $0x61] sm:$0xff]  ;;  %v2869_v32 = vld [vmem:[%s2705_s6 + $0x51] sm:$0xff] }
  0x1c   : > { %1984 = vmatpush.xpose.msk.msra.mxu0 %vm308_vm0, %v2749_v8  ;;  %3704 = vst [vmem:[#allocation15_spill] sm:$0xff] %v2775_v14  ;;  %v2832_v25 = vld [vmem:[%s2705_s6 + $0x129] sm:$0xff]  ;;  %v2852_v29 = vld [vmem:[%s2705_s6 + $0x121] sm:$0xff]  ;;  %v2872_v33 = vld [vmem:[%s2705_s6 + $0x111] sm:$0xff] }
  0x1d   : > { %2001 = vmatpush.xpose.msk.msra.mxu1 %vm308_vm0, %v2752_v9  ;;  %3705 = vst [vmem:[#allocation16_spill] sm:$0xff] %v2778_v15  ;;  %v2835_v26 = vld [vmem:[%s2705_s6 + $0x68] sm:$0xff]  ;;  %v2855_v30 = vld [vmem:[%s2705_s6 + $0x60] sm:$0xff]  ;;  %v2875_v34 = vld [vmem:[%s2705_s6 + $0x50] sm:$0xff] }
  0x1e   : > { %2018 = vmatpush.xpose.msk.msra.mxu2 %vm308_vm0, %v2755_v10  ;;  %3706 = vst [vmem:[#allocation17_spill] sm:$0xff] %v2795_v18  ;;  %v2838_v27 = vld [vmem:[%s2705_s6 + $0x128] sm:$0xff]  ;;  %v2858_v31 = vld [vmem:[%s2705_s6 + $0x120] sm:$0xff]  ;;  %v2878_v35 = vld [vmem:[%s2705_s6 + $0x110] sm:$0xff] }
  0x1f   : > { %2035 = vmatpush.xpose.msk.msra.mxu3 %vm308_vm0, %v2758_v11  ;;  %3707 = vst [vmem:[#allocation18_spill] sm:$0xff] %v2798_v19  ;;  %v2889_v36 = vld [vmem:[%s2705_s6 + $0x49] sm:$0xff]  ;;  %v2909_v40 = vld [vmem:[%s2705_s6 + $0x39] sm:$0xff]  ;;  %v2929_v44 = vld [vmem:[%s2705_s6 + $0x31] sm:$0xff] }
  0x20   : > { %1985 = vmatpush.xpose.msk.msra.mxu0 %vm308_vm0, %v2769_v12  ;;  %3708 = vst [vmem:[#allocation19_spill] sm:$0xff] %v2815_v22  ;;  %v2892_v37 = vld [vmem:[%s2705_s6 + $0x109] sm:$0xff]  ;;  %v2912_v41 = vld [vmem:[%s2705_s6 + $0xf9] sm:$0xff]  ;;  %v2932_v45 = vld [vmem:[%s2705_s6 + $0xf1] sm:$0xff] }
  0x21   : > { %2002 = vmatpush.xpose.msk.msra.mxu1 %vm308_vm0, %v2772_v13  ;;  %3709 = vst [vmem:[#allocation20_spill] sm:$0xff] %v2818_v23  ;;  %v2895_v38 = vld [vmem:[%s2705_s6 + $0x48] sm:$0xff]  ;;  %v2915_v42 = vld [vmem:[%s2705_s6 + $0x38] sm:$0xff]  ;;  %v2935_v46 = vld [vmem:[%s2705_s6 + $0x30] sm:$0xff] }
  0x22   : > { %2019 = vmatpush.xpose.msk.msra.mxu2 %vm308_vm0, %v2775_v14  ;;  %3710 = vst [vmem:[#allocation21_spill] sm:$0xff] %v2835_v26  ;;  %v2898_v39 = vld [vmem:[%s2705_s6 + $0x108] sm:$0xff]  ;;  %v2918_v43 = vld [vmem:[%s2705_s6 + $0xf8] sm:$0xff]  ;;  %v2938_v47 = vld [vmem:[%s2705_s6 + $0xf0] sm:$0xff] }
  0x23   : > { %2036 = vmatpush.xpose.msk.msra.mxu3 %vm308_vm0, %v2778_v15  ;;  %3711 = vst [vmem:[#allocation22_spill] sm:$0xff] %v2838_v27  ;;  %v2949_v48 = vld [vmem:[%s2705_s6 + $0x21] sm:$0xff]  ;;  %v2969_v52 = vld [vmem:[%s2705_s6 + $0x19] sm:$0xff]  ;;  %v275_v56 = vld [vmem:[%s2705_s6 + $0x9] sm:$0xff] }
  0x24   : > { %1986 = vmatpush.xpose.msk.msra.mxu0 %vm308_vm0, %v2789_v16  ;;  %3712 = vst [vmem:[#allocation23_spill] sm:$0xff] %v2855_v30  ;;  %v2952_v49 = vld [vmem:[%s2705_s6 + $0xe1] sm:$0xff]  ;;  %v2972_v53 = vld [vmem:[%s2705_s6 + $0xd9] sm:$0xff]  ;;  %v2990_v57 = vld [vmem:[%s2705_s6 + $0xc9] sm:$0xff] }
  0x25   : > { %2003 = vmatpush.xpose.msk.msra.mxu1 %vm308_vm0, %v2792_v17  ;;  %3713 = vst [vmem:[#allocation24_spill] sm:$0xff] %v2858_v31  ;;  %v2955_v50 = vld [vmem:[%s2705_s6 + $0x20] sm:$0xff]  ;;  %v2975_v54 = vld [vmem:[%s2705_s6 + $0x18] sm:$0xff]  ;;  %v242_v58 = vld [vmem:[%s2705_s6 + $0x8] sm:$0xff] }
  0x26   : > { %2020 = vmatpush.xpose.msk.msra.mxu2 %vm308_vm0, %v2795_v18  ;;  %3714 = vst [vmem:[#allocation25_spill] sm:$0xff] %v2875_v34  ;;  %v2958_v51 = vld [vmem:[%s2705_s6 + $0xe0] sm:$0xff]  ;;  %v2978_v55 = vld [vmem:[%s2705_s6 + $0xd8] sm:$0xff]  ;;  %v2994_v59 = vld [vmem:[%s2705_s6 + $0xc8] sm:$0xff] }
  0x27   : > { %2037 = vmatpush.xpose.msk.msra.mxu3 %vm308_vm0, %v2798_v19  ;;  %3715 = vst [vmem:[#allocation26_spill] sm:$0xff] %v2878_v35  ;;  %v274_v60 = vld [vmem:[%s2705_s6 + $0x1] sm:$0xff] }
  0x28   : > { %1987 = vmatpush.xpose.msk.msra.mxu0 %vm308_vm0, %v2809_v20  ;;  %3716 = vst [vmem:[#allocation27_spill] sm:$0xff] %v2895_v38  ;;  %v3004_v61 = vld [vmem:[%s2705_s6 + $0xc1] sm:$0xff] }
  0x29   : > { %2004 = vmatpush.xpose.msk.msra.mxu1 %vm308_vm0, %v2812_v21  ;;  %3717 = vst [vmem:[#allocation28_spill] sm:$0xff] %v2898_v39  ;;  %v241_v62 = vld [vmem:[%s2705_s6] sm:$0xff] }
  0x2a   : > { %2021 = vmatpush.xpose.msk.msra.mxu2 %vm308_vm0, %v2815_v22  ;;  %3718 = vst [vmem:[#allocation29_spill] sm:$0xff] %v2915_v42  ;;  %v3008_v63 = vld [vmem:[%s2705_s6 + $0xc0] sm:$0xff] }
  0x2b   : > { %2038 = vmatpush.xpose.msk.msra.mxu3 %vm308_vm0, %v2818_v23  ;;  %3719 = vst [vmem:[#allocation30_spill] sm:$0xff] %v2918_v43 }
  0x2c   : > { %1988 = vmatpush.xpose.msk.msra.mxu0 %vm308_vm0, %v2829_v24  ;;  %3720 = vst [vmem:[#allocation31_spill] sm:$0xff] %v2935_v46 }
  0x2d   : > { %2005 = vmatpush.xpose.msk.msra.mxu1 %vm308_vm0, %v2832_v25  ;;  %3721 = vst [vmem:[#allocation32_spill] sm:$0xff] %v2938_v47 }
  0x2e   : > { %2022 = vmatpush.xpose.msk.msra.mxu2 %vm308_vm0, %v2835_v26  ;;  %3722 = vst [vmem:[#allocation33_spill] sm:$0xff] %v2949_v48 }
  0x2f   : > { %2039 = vmatpush.xpose.msk.msra.mxu3 %vm308_vm0, %v2838_v27  ;;  %3723 = vst [vmem:[#allocation34_spill] sm:$0xff] %v2952_v49 }
  0x30   : > { %1989 = vmatpush.xpose.msk.msra.mxu0 %vm308_vm0, %v2849_v28  ;;  %3724 = vst [vmem:[#allocation35_spill] sm:$0xff] %v2969_v52 }
  0x31   : > { %2006 = vmatpush.xpose.msk.msra.mxu1 %vm308_vm0, %v2852_v29  ;;  %3725 = vst [vmem:[#allocation36_spill] sm:$0xff] %v2972_v53 }
  0x32   : > { %2023 = vmatpush.xpose.msk.msra.mxu2 %vm308_vm0, %v2855_v30  ;;  %3726 = vst [vmem:[#allocation37_spill] sm:$0xff] %v2994_v59 }
  0x33   : > { %2040 = vmatpush.xpose.msk.msra.mxu3 %vm308_vm0, %v2858_v31  ;;  %3727 = vst [vmem:[#allocation38_spill] sm:$0xff] %v3008_v63 }
  0x34   : > { %1990 = vmatpush.xpose.msk.msra.mxu0 %vm308_vm0, %v2869_v32 }
  0x35   : > { %2007 = vmatpush.xpose.msk.msra.mxu1 %vm308_vm0, %v2872_v33 }
  0x36   : > { %2024 = vmatpush.xpose.msk.msra.mxu2 %vm308_vm0, %v2875_v34 }
  0x37   : > { %2041 = vmatpush.xpose.msk.msra.mxu3 %vm308_vm0, %v2878_v35 }
  0x38   : > { %1991 = vmatpush.xpose.msk.msra.mxu0 %vm308_vm0, %v2889_v36 }
  0x39   : > { %2008 = vmatpush.xpose.msk.msra.mxu1 %vm308_vm0, %v2892_v37 }
  0x3a   : > { %2025 = vmatpush.xpose.msk.msra.mxu2 %vm308_vm0, %v2895_v38 }
  0x3b   : > { %2042 = vmatpush.xpose.msk.msra.mxu3 %vm308_vm0, %v2898_v39 }
  0x3c   : > { %1992 = vmatpush.xpose.msk.msra.mxu0 %vm308_vm0, %v2909_v40 }
  0x3d   : > { %2009 = vmatpush.xpose.msk.msra.mxu1 %vm308_vm0, %v2912_v41 }
  0x3e   : > { %2026 = vmatpush.xpose.msk.msra.mxu2 %vm308_vm0, %v2915_v42 }
  0x3f   : > { %2043 = vmatpush.xpose.msk.msra.mxu3 %vm308_vm0, %v2918_v43 }
  0x40   : > { %1993 = vmatpush.xpose.msk.msra.mxu0 %vm308_vm0, %v2929_v44 }
  0x41   : > { %2010 = vmatpush.xpose.msk.msra.mxu1 %vm308_vm0, %v2932_v45 }
  0x42   : > { %2027 = vmatpush.xpose.msk.msra.mxu2 %vm308_vm0, %v2935_v46 }
  0x43   : > { %2044 = vmatpush.xpose.msk.msra.mxu3 %vm308_vm0, %v2938_v47 }
  0x44   : > { %1994 = vmatpush.xpose.msk.msra.mxu0 %vm308_vm0, %v2949_v48  ;;  %v273_v48 = vld [vmem:[%s3655_s1] sm:$0xff] }
  0x45   : > { %2011 = vmatpush.xpose.msk.msra.mxu1 %vm308_vm0, %v2952_v49  ;;  %v3096_v49 = vld [vmem:[%s2705_s6 + $0x13a] sm:$0xff] }
  0x46   : > { %2028 = vmatpush.xpose.msk.msra.mxu2 %vm308_vm0, %v2955_v50 }
  0x47   : > { %2045 = vmatpush.xpose.msk.msra.mxu3 %vm308_vm0, %v2958_v51 }
  0x48   : > { %1995 = vmatpush.xpose.msk.msra.mxu0 %vm308_vm0, %v2969_v52  ;;  %v3040_v52 = vld [vmem:[%s2705_s6 + $0x180] sm:$0xff] }
  0x49   : > { %2012 = vmatpush.xpose.msk.msra.mxu1 %vm308_vm0, %v2972_v53  ;;  %v3011_v53 = vld [vmem:[%s2705_s6 + $0xb2] sm:$0xff]  ;;  %3729 = vst [vmem:[#allocation40_spill] sm:$0xff] %v3040_v52 }
  0x4a   : > { %2029 = vmatpush.xpose.msk.msra.mxu2 %vm308_vm0, %v2975_v54 }
  0x4b   : > { %2046 = vmatpush.xpose.msk.msra.mxu3 %vm308_vm0, %v2978_v55 }
  0x4c   : > { %1996 = vmatpush.xpose.msk.msra.mxu0 %vm308_vm0, %v275_v56  ;;  %v3014_v56 = vld [vmem:[%s2705_s6 + $0x172] sm:$0xff] }
  0x4d   : > { %2013 = vmatpush.xpose.msk.msra.mxu1 %vm308_vm0, %v2990_v57 }
  0x4e   : > { %2030 = vmatpush.xpose.msk.msra.mxu2 %vm308_vm0, %v242_v58  ;;  %v3020_v58 = vld [vmem:[%s2705_s6 + $0x188] sm:$0xff] }
  0x4f   : > { %2047 = vmatpush.xpose.msk.msra.mxu3 %vm308_vm0, %v2994_v59  ;;  %3728 = vst [vmem:[#allocation39_spill] sm:$0xff] %v3020_v58 }
  0x50   : > { %1997 = vmatpush.xpose.msk.msra.mxu0 %vm308_vm0, %v274_v60  ;;  %v3034_v60 = vld [vmem:[%s2705_s6 + $0xaa] sm:$0xff] }
  0x51   : > { %2014 = vmatpush.xpose.msk.msra.mxu1 %vm308_vm0, %v3004_v61 }
  0x52   : > { %2031 = vmatpush.xpose.msk.msra.mxu2 %vm308_vm0, %v241_v62  ;;  %v3037_v62 = vld [vmem:[%s2705_s6 + $0x16a] sm:$0xff] }
  0x53   : > { %2048 = vmatpush.xpose.msk.msra.mxu3 %vm308_vm0, %v3008_v63 }
  0x54   : > { %2051 = vmatpush.xpose.msk.msrb.mxu0 %vm308_vm0, %v3011_v53 }
  0x55   : > { %2068 = vmatpush.xpose.msk.msrb.mxu1 %vm308_vm0, %v3014_v56  ;;  %2032 = vmatmul.msk.f32.vlgmr.msra.gmra.mxu2 %vm308_vm0, %v273_v48 }
  0x56   : > { %2118 = vmatpush.xpose.msk.msrb.mxu2 %vm308_vm0, %v2994_v59  ;;  %v3054_v59 = vld [vmem:[%s2705_s6 + $0x15a] sm:$0xff]  ;;  %2049 = vmatmul.msk.f32.vlgmr.msra.gmra.mxu3 %vm308_vm0, %v273_v48  ;;  %v3145_v48 = vld [vmem:[%s2705_s6 + $0x52] sm:$0xff] }
  0x57   : > { %2135 = vmatpush.xpose.msk.msrb.mxu3 %vm308_vm0, %v3020_v58  ;;  %v3051_v58 = vld [vmem:[%s2705_s6 + $0x9a] sm:$0xff] }
  0x58   : > { %2052 = vmatpush.xpose.msk.msrb.mxu0 %vm308_vm0, %v3034_v60 }
  0x59   : > { %2069 = vmatpush.xpose.msk.msrb.mxu1 %vm308_vm0, %v3037_v62 }
  0x5a   : > { %2119 = vmatpush.xpose.msk.msrb.mxu2 %vm308_vm0, %v3008_v63  ;;  %v3065_v63 = vld [vmem:[%s2705_s6 + $0x92] sm:$0xff] }
  0x5b   : > { %2136 = vmatpush.xpose.msk.msrb.mxu3 %vm308_vm0, %v3040_v52  ;;  %v3068_v52 = vld [vmem:[%s2705_s6 + $0x152] sm:$0xff] }
  0x5c   : > { %2053 = vmatpush.xpose.msk.msrb.mxu0 %vm308_vm0, %v3051_v58 }
  0x5d   : > { %2070 = vmatpush.xpose.msk.msrb.mxu1 %vm308_vm0, %v3054_v59 }
  0x5e   : > { %2120 = vmatpush.xpose.msk.msrb.mxu2 %vm308_vm0, %v2715_v2  ;;  %v3079_v2 = vld [vmem:[%s2705_s6 + $0x82] sm:$0xff] }
  0x5f   : > { %2137 = vmatpush.xpose.msk.msrb.mxu3 %vm308_vm0, %v2722_v3  ;;  %v3082_v3 = vld [vmem:[%s2705_s6 + $0x142] sm:$0xff] }
  0x60   : > { %2054 = vmatpush.xpose.msk.msrb.mxu0 %vm308_vm0, %v3065_v63 }
  0x61   : > { %2071 = vmatpush.xpose.msk.msrb.mxu1 %vm308_vm0, %v3068_v52 }
  0x62   : > { %2121 = vmatpush.xpose.msk.msrb.mxu2 %vm308_vm0, %v2735_v6  ;;  %v3093_v6 = vld [vmem:[%s2705_s6 + $0x7a] sm:$0xff] }
  0x63   : > { %2138 = vmatpush.xpose.msk.msrb.mxu3 %vm308_vm0, %v2738_v7  ;;  %v3103_v7 = vld [vmem:[%s2705_s6 + $0x6a] sm:$0xff] }
  0x64   : > { %2055 = vmatpush.xpose.msk.msrb.mxu0 %vm308_vm0, %v3079_v2 }
  0x65   : > { %2072 = vmatpush.xpose.msk.msrb.mxu1 %vm308_vm0, %v3082_v3 }
  0x66   : > { %2122 = vmatpush.xpose.msk.msrb.mxu2 %vm308_vm0, %v2755_v10  ;;  %v1981_v10 = vld [vmem:[%s3655_s1 + $0x8] sm:$0xff] }
  0x67   : > { %2139 = vmatpush.xpose.msk.msrb.mxu3 %vm308_vm0, %v2758_v11  ;;  %v3110_v11 = vld [vmem:[%s2705_s6 + $0x12a] sm:$0xff]  ;;  %1998 = vmatmul.msk.f32.vlgmr.msra.gmra.mxu0 %vm308_vm0, %v1981_v10 }
  0x68   : > { %2056 = vmatpush.xpose.msk.msrb.mxu0 %vm308_vm0, %v3093_v6  ;;  %2015 = vmatmul.msk.f32.vlgmr.msra.gmra.mxu1 %vm308_vm0, %v1981_v10  ;;  %v3134_v10 = vld [vmem:[%s2705_s6 + $0x122] sm:$0xff] }
  0x69   : > { %2073 = vmatpush.xpose.msk.msrb.mxu1 %vm308_vm0, %v3096_v49 }
  0x6a   : > { %2123 = vmatpush.xpose.msk.msrb.mxu2 %vm308_vm0, %v2775_v14  ;;  %v3276_v14 = vld [vmem:[%s2705_s6 + $0x182] sm:$0xff] }
  0x6b   : > { %2140 = vmatpush.xpose.msk.msrb.mxu3 %vm308_vm0, %v2778_v15  ;;  %v3131_v15 = vld [vmem:[%s2705_s6 + $0x62] sm:$0xff] }
  0x6c   : > { %2057 = vmatpush.xpose.msk.msrb.mxu0 %vm308_vm0, %v3103_v7 }
  0x6d   : > { %2074 = vmatpush.xpose.msk.msrb.mxu1 %vm308_vm0, %v3110_v11 }
  0x6e   : > { %2124 = vmatpush.xpose.msk.msrb.mxu2 %vm308_vm0, %v2795_v18  ;;  %v3230_v18 = vld [vmem:[%s2705_s6 + $0xca] sm:$0xff] }
  0x6f   : > { %2141 = vmatpush.xpose.msk.msrb.mxu3 %vm308_vm0, %v2798_v19  ;;  %v3148_v19 = vld [vmem:[%s2705_s6 + $0x112] sm:$0xff] }
  0x70   : > { %2058 = vmatpush.xpose.msk.msrb.mxu0 %vm308_vm0, %v3131_v15 }
  0x71   : > { %2075 = vmatpush.xpose.msk.msrb.mxu1 %vm308_vm0, %v3134_v10 }
  0x72   : > { %2125 = vmatpush.xpose.msk.msrb.mxu2 %vm308_vm0, %v2815_v22  ;;  %v3159_v22 = vld [vmem:[%s2705_s6 + $0x4a] sm:$0xff] }
  0x73   : > { %2142 = vmatpush.xpose.msk.msrb.mxu3 %vm308_vm0, %v2818_v23  ;;  %v3162_v23 = vld [vmem:[%s2705_s6 + $0x10a] sm:$0xff] }
  0x74   : > { %2059 = vmatpush.xpose.msk.msrb.mxu0 %vm308_vm0, %v3145_v48 }
  0x75   : > { %2076 = vmatpush.xpose.msk.msrb.mxu1 %vm308_vm0, %v3148_v19 }
  0x76   : > { %2126 = vmatpush.xpose.msk.msrb.mxu2 %vm308_vm0, %v2835_v26  ;;  %v3173_v26 = vld [vmem:[%s2705_s6 + $0x3a] sm:$0xff] }
  0x77   : > { %2143 = vmatpush.xpose.msk.msrb.mxu3 %vm308_vm0, %v2838_v27  ;;  %3730 = vst [vmem:[#allocation41_spill] sm:$0xff] %v3173_v26  ;;  %v3176_v27 = vld [vmem:[%s2705_s6 + $0xfa] sm:$0xff] }
  0x78   : > { %2060 = vmatpush.xpose.msk.msrb.mxu0 %vm308_vm0, %v3159_v22  ;;  %3731 = vst [vmem:[#allocation42_spill] sm:$0xff] %v3176_v27 }
  0x79   : > { %2077 = vmatpush.xpose.msk.msrb.mxu1 %vm308_vm0, %v3162_v23 }
  0x7a   : > { %2127 = vmatpush.xpose.msk.msrb.mxu2 %vm308_vm0, %v2855_v30  ;;  %v3187_v30 = vld [vmem:[%s2705_s6 + $0x32] sm:$0xff] }
  0x7b   : > { %2144 = vmatpush.xpose.msk.msrb.mxu3 %vm308_vm0, %v2858_v31  ;;  %3732 = vst [vmem:[#allocation43_spill] sm:$0xff] %v3187_v30  ;;  %v3190_v31 = vld [vmem:[%s2705_s6 + $0xf2] sm:$0xff] }
  0x7c   : > { %2061 = vmatpush.xpose.msk.msrb.mxu0 %vm308_vm0, %v3173_v26  ;;  %3733 = vst [vmem:[#allocation44_spill] sm:$0xff] %v3190_v31 }
  0x7d   : > { %2078 = vmatpush.xpose.msk.msrb.mxu1 %vm308_vm0, %v3176_v27 }
  0x7e   : > { %2128 = vmatpush.xpose.msk.msrb.mxu2 %vm308_vm0, %v2875_v34  ;;  %v3201_v34 = vld [vmem:[%s2705_s6 + $0x22] sm:$0xff] }
  0x7f   : > { %2145 = vmatpush.xpose.msk.msrb.mxu3 %vm308_vm0, %v2878_v35  ;;  %v3204_v35 = vld [vmem:[%s2705_s6 + $0xe2] sm:$0xff] }
  0x80   : > { %2062 = vmatpush.xpose.msk.msrb.mxu0 %vm308_vm0, %v3187_v30 }
  0x81   : > { %2079 = vmatpush.xpose.msk.msrb.mxu1 %vm308_vm0, %v3190_v31 }
  0x82   : > { %2129 = vmatpush.xpose.msk.msrb.mxu2 %vm308_vm0, %v2895_v38  ;;  %v3218_v38 = vld [vmem:[%s2705_s6 + $0xda] sm:$0xff] }
  0x83   : > { %2146 = vmatpush.xpose.msk.msrb.mxu3 %vm308_vm0, %v2898_v39  ;;  %v3215_v39 = vld [vmem:[%s2705_s6 + $0x1a] sm:$0xff] }
  0x84   : > { %2063 = vmatpush.xpose.msk.msrb.mxu0 %vm308_vm0, %v3201_v34 }
  0x85   : > { %2080 = vmatpush.xpose.msk.msrb.mxu1 %vm308_vm0, %v3204_v35 }
  0x86   : > { %2130 = vmatpush.xpose.msk.msrb.mxu2 %vm308_vm0, %v2915_v42  ;;  %v588_v42 = vld [vmem:[%s2705_s6 + $0xa] sm:$0xff] }
  0x87   : > { %2147 = vmatpush.xpose.msk.msrb.mxu3 %vm308_vm0, %v2918_v43  ;;  %v587_v43 = vld [vmem:[%s2705_s6 + $0x2] sm:$0xff] }
  0x88   : > { %2064 = vmatpush.xpose.msk.msrb.mxu0 %vm308_vm0, %v3215_v39 }
  0x89   : > { %2081 = vmatpush.xpose.msk.msrb.mxu1 %vm308_vm0, %v3218_v38 }
  0x8a   : > { %2131 = vmatpush.xpose.msk.msrb.mxu2 %vm308_vm0, %v2935_v46  ;;  %v3241_v46 = vld [vmem:[%s2705_s6 + $0xc2] sm:$0xff] }
  0x8b   : > { %2148 = vmatpush.xpose.msk.msrb.mxu3 %vm308_vm0, %v2938_v47  ;;  %v3244_v47 = vld [vmem:[%s2705_s6 + $0x189] sm:$0xff] }
  0x8c   : > { %2065 = vmatpush.xpose.msk.msrb.mxu0 %vm308_vm0, %v588_v42  ;;  %v3250_v42 = vld [vmem:[%s2705_s6 + $0x18a] sm:$0xff] }
  0x8d   : > { %2082 = vmatpush.xpose.msk.msrb.mxu1 %vm308_vm0, %v3230_v18 }
  0x8e   : > { %2132 = vmatpush.xpose.msk.msrb.mxu2 %vm308_vm0, %v2955_v50  ;;  %v2050_v50 = vld [vmem:[%s3655_s1 + $0x10] sm:$0xff] }
  0x8f   : > { %2149 = vmatpush.xpose.msk.msrb.mxu3 %vm308_vm0, %v2958_v51 }
  0x90   : > { %2066 = vmatpush.xpose.msk.msrb.mxu0 %vm308_vm0, %v587_v43  ;;  %v2117_v43 = vld [vmem:[%s3655_s1 + $0x18] sm:$0xff] }
  0x91   : > { %2083 = vmatpush.xpose.msk.msrb.mxu1 %vm308_vm0, %v3241_v46 }
  0x92   : > { %2133 = vmatpush.xpose.msk.msrb.mxu2 %vm308_vm0, %v2975_v54  ;;  %v3271_v54 = vld [vmem:[%s2705_s6 + $0x181] sm:$0xff] }
  0x93   : > { %2150 = vmatpush.xpose.msk.msrb.mxu3 %vm308_vm0, %v2978_v55  ;;  %2067 = vmatmul.msk.f32.vlgmr.msrb.gmra.mxu0 %vm308_vm0, %v2050_v50 }
  0x94   : > { %2185 = vmatpush.xpose.msk.msra.mxu0 %vm308_vm0, %v2990_v57  ;;  %2084 = vmatmul.msk.f32.vlgmr.msrb.gmra.mxu1 %vm308_vm0, %v2050_v50  ;;  %v3734_v50 = vld [vmem:[#allocation33_spill] sm:$0xff] }
  0x95   : > { %2202 = vmatpush.xpose.msk.msra.mxu1 %vm308_vm0, %v3244_v47  ;;  %2134 = vmatmul.msk.f32.vlgmr.msrb.gmra.mxu2 %vm308_vm0, %v2117_v43 }
  0x96   : > { %2252 = vmatpush.xpose.msk.msra.mxu2 %vm308_vm0, %v3230_v18  ;;  %2151 = vmatmul.msk.f32.vlgmr.msrb.gmra.mxu3 %vm308_vm0, %v2117_v43  ;;  %v3735_v43 = vld [vmem:[#allocation34_spill] sm:$0xff] }
  0x97   : > { %2269 = vmatpush.xpose.msk.msra.mxu3 %vm308_vm0, %v3250_v42 }
  0x98   : > { %2186 = vmatpush.xpose.msk.msra.mxu0 %vm308_vm0, %v3004_v61 }
  0x99   : > { %2203 = vmatpush.xpose.msk.msra.mxu1 %vm308_vm0, %v3271_v54 }
  0x9a   : > { %2253 = vmatpush.xpose.msk.msra.mxu2 %vm308_vm0, %v3241_v46 }
  0x9b   : > { %2270 = vmatpush.xpose.msk.msra.mxu3 %vm308_vm0, %v3276_v14 }
  0x9c   : > { %2187 = vmatpush.xpose.msk.msra.mxu0 %vm308_vm0, %v2709_v0 }
  0x9d   : > { %2204 = vmatpush.xpose.msk.msra.mxu1 %vm308_vm0, %v2712_v1 }
  0x9e   : > { %2254 = vmatpush.xpose.msk.msra.mxu2 %vm308_vm0, %v3011_v53 }
  0x9f   : > { %2271 = vmatpush.xpose.msk.msra.mxu3 %vm308_vm0, %v3014_v56 }
  0xa0   : > { %2188 = vmatpush.xpose.msk.msra.mxu0 %vm308_vm0, %v2729_v4 }
  0xa1   : > { %2205 = vmatpush.xpose.msk.msra.mxu1 %vm308_vm0, %v2732_v5 }
  0xa2   : > { %2255 = vmatpush.xpose.msk.msra.mxu2 %vm308_vm0, %v3034_v60 }
  0xa3   : > { %2272 = vmatpush.xpose.msk.msra.mxu3 %vm308_vm0, %v3037_v62 }
  0xa4   : > { %2189 = vmatpush.xpose.msk.msra.mxu0 %vm308_vm0, %v2749_v8 }
  0xa5   : > { %2206 = vmatpush.xpose.msk.msra.mxu1 %vm308_vm0, %v2752_v9 }
  0xa6   : > { %2256 = vmatpush.xpose.msk.msra.mxu2 %vm308_vm0, %v3051_v58 }
  0xa7   : > { %2273 = vmatpush.xpose.msk.msra.mxu3 %vm308_vm0, %v3054_v59 }
  0xa8   : > { %2190 = vmatpush.xpose.msk.msra.mxu0 %vm308_vm0, %v2769_v12 }
  0xa9   : > { %2207 = vmatpush.xpose.msk.msra.mxu1 %vm308_vm0, %v2772_v13 }
  0xaa   : > { %2257 = vmatpush.xpose.msk.msra.mxu2 %vm308_vm0, %v3065_v63 }
  0xab   : > { %2274 = vmatpush.xpose.msk.msra.mxu3 %vm308_vm0, %v3068_v52 }
  0xac   : > { %2191 = vmatpush.xpose.msk.msra.mxu0 %vm308_vm0, %v2789_v16 }
  0xad   : > { %2208 = vmatpush.xpose.msk.msra.mxu1 %vm308_vm0, %v2792_v17 }
  0xae   : > { %2258 = vmatpush.xpose.msk.msra.mxu2 %vm308_vm0, %v3079_v2 }
  0xaf   : > { %2275 = vmatpush.xpose.msk.msra.mxu3 %vm308_vm0, %v3082_v3 }
  0xb0   : > { %2192 = vmatpush.xpose.msk.msra.mxu0 %vm308_vm0, %v2809_v20 }
  0xb1   : > { %2209 = vmatpush.xpose.msk.msra.mxu1 %vm308_vm0, %v2812_v21 }
  0xb2   : > { %2259 = vmatpush.xpose.msk.msra.mxu2 %vm308_vm0, %v3093_v6 }
  0xb3   : > { %2276 = vmatpush.xpose.msk.msra.mxu3 %vm308_vm0, %v3096_v49 }
  0xb4   : > { %2193 = vmatpush.xpose.msk.msra.mxu0 %vm308_vm0, %v2829_v24 }
  0xb5   : > { %2210 = vmatpush.xpose.msk.msra.mxu1 %vm308_vm0, %v2832_v25 }
  0xb6   : > { %2260 = vmatpush.xpose.msk.msra.mxu2 %vm308_vm0, %v3103_v7 }
  0xb7   : > { %2277 = vmatpush.xpose.msk.msra.mxu3 %vm308_vm0, %v3110_v11 }
  0xb8   : > { %2194 = vmatpush.xpose.msk.msra.mxu0 %vm308_vm0, %v2849_v28 }
  0xb9   : > { %2211 = vmatpush.xpose.msk.msra.mxu1 %vm308_vm0, %v2852_v29 }
  0xba   : > { %2261 = vmatpush.xpose.msk.msra.mxu2 %vm308_vm0, %v3131_v15 }
  0xbb   : > { %2278 = vmatpush.xpose.msk.msra.mxu3 %vm308_vm0, %v3134_v10 }
  0xbc   : > { %2195 = vmatpush.xpose.msk.msra.mxu0 %vm308_vm0, %v2869_v32 }
  0xbd   : > { %2212 = vmatpush.xpose.msk.msra.mxu1 %vm308_vm0, %v2872_v33 }
  0xbe   : > { %2262 = vmatpush.xpose.msk.msra.mxu2 %vm308_vm0, %v3145_v48 }
  0xbf   : > { %2279 = vmatpush.xpose.msk.msra.mxu3 %vm308_vm0, %v3148_v19 }
  0xc0   : > { %2196 = vmatpush.xpose.msk.msra.mxu0 %vm308_vm0, %v2889_v36 }
  0xc1   : > { %2213 = vmatpush.xpose.msk.msra.mxu1 %vm308_vm0, %v2892_v37 }
  0xc2   : > { %2263 = vmatpush.xpose.msk.msra.mxu2 %vm308_vm0, %v3159_v22 }
  0xc3   : > { %2280 = vmatpush.xpose.msk.msra.mxu3 %vm308_vm0, %v3162_v23 }
  0xc4   : > { %2197 = vmatpush.xpose.msk.msra.mxu0 %vm308_vm0, %v2909_v40 }
  0xc5   : > { %2214 = vmatpush.xpose.msk.msra.mxu1 %vm308_vm0, %v2912_v41 }
  0xc6   : > { %2264 = vmatpush.xpose.msk.msra.mxu2 %vm308_vm0, %v3173_v26  ;;  %v3736_v26 = vld [vmem:[#allocation35_spill] sm:$0xff] }
  0xc7   : > { %2281 = vmatpush.xpose.msk.msra.mxu3 %vm308_vm0, %v3176_v27  ;;  %v2317_v27 = vld [vmem:[%s2705_s6 + $0x1a0] sm:$0xff] }
  0xc8   : > { %2198 = vmatpush.xpose.msk.msra.mxu0 %vm308_vm0, %v2929_v44 }
  0xc9   : > { %2215 = vmatpush.xpose.msk.msra.mxu1 %vm308_vm0, %v2932_v45 }
  0xca   : > { %2265 = vmatpush.xpose.msk.msra.mxu2 %vm308_vm0, %v3187_v30  ;;  %v3737_v30 = vld [vmem:[#allocation36_spill] sm:$0xff] }
  0xcb   : > { %2282 = vmatpush.xpose.msk.msra.mxu3 %vm308_vm0, %v3190_v31  ;;  %v2384_v31 = vld [vmem:[%s2705_s6 + $0x1a1] sm:$0xff] }
  0xcc   : > { %2199 = vmatpush.xpose.msk.msra.mxu0 %vm308_vm0, %v3734_v50  ;;  %v2383_v50 = vld [vmem:[%s2705_s6 + $0x199] sm:$0xff] }
  0xcd   : > { %2216 = vmatpush.xpose.msk.msra.mxu1 %vm308_vm0, %v3735_v43 }
  0xce   : > { %2266 = vmatpush.xpose.msk.msra.mxu2 %vm308_vm0, %v3201_v34  ;;  %v2184_v34 = vld [vmem:[%s3655_s1 + $0x20] sm:$0xff] }
  0xcf   : > { %2283 = vmatpush.xpose.msk.msra.mxu3 %vm308_vm0, %v3204_v35 }
  0xd0   : > { %2200 = vmatpush.xpose.msk.msra.mxu0 %vm308_vm0, %v3736_v26  ;;  %v2251_v26 = vld [vmem:[%s3655_s1 + $0x28] sm:$0xff] }
  0xd1   : > { %2217 = vmatpush.xpose.msk.msra.mxu1 %vm308_vm0, %v3737_v30 }
  0xd2   : > { %2267 = vmatpush.xpose.msk.msra.mxu2 %vm308_vm0, %v3215_v39  ;;  %v2316_v39 = vld [vmem:[%s2705_s6 + $0x198] sm:$0xff] }
  0xd3   : > { %2284 = vmatpush.xpose.msk.msra.mxu3 %vm308_vm0, %v3218_v38  ;;  %2201 = vmatmul.msk.f32.vlgmr.msra.gmra.mxu0 %vm308_vm0, %v2184_v34 }
  0xd4   : > { %2319 = vmatpush.xpose.msk.msrb.mxu0 %vm308_vm0, %v2958_v51  ;;  %2218 = vmatmul.msk.f32.vlgmr.msra.gmra.mxu1 %vm308_vm0, %v2184_v34  ;;  %v3740_v51 = vld [vmem:[#allocation38_spill] sm:$0xff] }
  0xd5   : > { %2336 = vmatpush.xpose.msk.msrb.mxu1 %vm308_vm0, %v2317_v27  ;;  %2268 = vmatmul.msk.f32.vlgmr.msra.gmra.mxu2 %vm308_vm0, %v2251_v26  ;;  %v3738_v27 = vld [vmem:[#allocation37_spill] sm:$0xff] }
  0xd6   : > { %2386 = vmatpush.xpose.msk.msrb.mxu2 %vm308_vm0, %v3735_v43  ;;  %2285 = vmatmul.msk.f32.vlgmr.msra.gmra.mxu3 %vm308_vm0, %v2251_v26  ;;  %v3743_v43 = vld [vmem:[#allocation10_spill] sm:$0xff] }
  0xd7   : > { %2403 = vmatpush.xpose.msk.msrb.mxu3 %vm308_vm0, %v2384_v31  ;;  %v3739_v31 = vld [vmem:[#allocation39_spill] sm:$0xff] }
  0xd8   : > { %2320 = vmatpush.xpose.msk.msrb.mxu0 %vm308_vm0, %v2978_v55  ;;  %v3741_v55 = vld [vmem:[#allocation40_spill] sm:$0xff] }
  0xd9   : > { %2337 = vmatpush.xpose.msk.msrb.mxu1 %vm308_vm0, %v2316_v39 }
  0xda   : > { %2387 = vmatpush.xpose.msk.msrb.mxu2 %vm308_vm0, %v3737_v30  ;;  %v3742_v30 = vld [vmem:[#allocation9_spill] sm:$0xff] }
  0xdb   : > { %2404 = vmatpush.xpose.msk.msrb.mxu3 %vm308_vm0, %v2383_v50 }
  0xdc   : > { %2321 = vmatpush.xpose.msk.msrb.mxu0 %vm308_vm0, %v3738_v27 }
  0xdd   : > { %2338 = vmatpush.xpose.msk.msrb.mxu1 %vm308_vm0, %v3739_v31 }
  0xde   : > { %2388 = vmatpush.xpose.msk.msrb.mxu2 %vm308_vm0, %v2990_v57  ;;  %v3745_v57 = vld [vmem:[#allocation12_spill] sm:$0xff] }
  0xdf   : > { %2405 = vmatpush.xpose.msk.msrb.mxu3 %vm308_vm0, %v3244_v47  ;;  %v3744_v47 = vld [vmem:[#allocation11_spill] sm:$0xff] }
  0xe0   : > { %2322 = vmatpush.xpose.msk.msrb.mxu0 %vm308_vm0, %v3740_v51 }
  0xe1   : > { %2339 = vmatpush.xpose.msk.msrb.mxu1 %vm308_vm0, %v3741_v55 }
  0xe2   : > { %2389 = vmatpush.xpose.msk.msrb.mxu2 %vm308_vm0, %v3004_v61  ;;  %v3746_v61 = vld [vmem:[#allocation13_spill] sm:$0xff] }
  0xe3   : > { %2406 = vmatpush.xpose.msk.msrb.mxu3 %vm308_vm0, %v3271_v54  ;;  %v3747_v54 = vld [vmem:[#allocation14_spill] sm:$0xff] }
  0xe4   : > { %2323 = vmatpush.xpose.msk.msrb.mxu0 %vm308_vm0, %v3742_v30 }
  0xe5   : > { %2340 = vmatpush.xpose.msk.msrb.mxu1 %vm308_vm0, %v3743_v43 }
  0xe6   : > { %2390 = vmatpush.xpose.msk.msrb.mxu2 %vm308_vm0, %v2709_v0  ;;  %v3748_v0 = vld [vmem:[#allocation15_spill] sm:$0xff] }
  0xe7   : > { %2407 = vmatpush.xpose.msk.msrb.mxu3 %vm308_vm0, %v2712_v1  ;;  %v3749_v1 = vld [vmem:[#allocation16_spill] sm:$0xff] }
  0xe8   : > { %2324 = vmatpush.xpose.msk.msrb.mxu0 %vm308_vm0, %v3744_v47 }
  0xe9   : > { %2341 = vmatpush.xpose.msk.msrb.mxu1 %vm308_vm0, %v3745_v57 }
  0xea   : > { %2391 = vmatpush.xpose.msk.msrb.mxu2 %vm308_vm0, %v2729_v4  ;;  %v3750_v4 = vld [vmem:[#allocation17_spill] sm:$0xff] }
  0xeb   : > { %2408 = vmatpush.xpose.msk.msrb.mxu3 %vm308_vm0, %v2732_v5  ;;  %v3751_v5 = vld [vmem:[#allocation18_spill] sm:$0xff] }
  0xec   : > { %2325 = vmatpush.xpose.msk.msrb.mxu0 %vm308_vm0, %v3746_v61 }
  0xed   : > { %2342 = vmatpush.xpose.msk.msrb.mxu1 %vm308_vm0, %v3747_v54 }
  0xee   : > { %2392 = vmatpush.xpose.msk.msrb.mxu2 %vm308_vm0, %v2749_v8  ;;  %v3752_v8 = vld [vmem:[#allocation19_spill] sm:$0xff] }
  0xef   : > { %2409 = vmatpush.xpose.msk.msrb.mxu3 %vm308_vm0, %v2752_v9  ;;  %v3753_v9 = vld [vmem:[#allocation20_spill] sm:$0xff] }
  0xf0   : > { %2326 = vmatpush.xpose.msk.msrb.mxu0 %vm308_vm0, %v3748_v0 }
  0xf1   : > { %2343 = vmatpush.xpose.msk.msrb.mxu1 %vm308_vm0, %v3749_v1 }
  0xf2   : > { %2393 = vmatpush.xpose.msk.msrb.mxu2 %vm308_vm0, %v2769_v12  ;;  %v3754_v12 = vld [vmem:[#allocation21_spill] sm:$0xff] }
  0xf3   : > { %2410 = vmatpush.xpose.msk.msrb.mxu3 %vm308_vm0, %v2772_v13  ;;  %v3755_v13 = vld [vmem:[#allocation22_spill] sm:$0xff] }
  0xf4   : > { %2327 = vmatpush.xpose.msk.msrb.mxu0 %vm308_vm0, %v3750_v4 }
  0xf5   : > { %2344 = vmatpush.xpose.msk.msrb.mxu1 %vm308_vm0, %v3751_v5 }
  0xf6   : > { %2394 = vmatpush.xpose.msk.msrb.mxu2 %vm308_vm0, %v2789_v16  ;;  %v3756_v16 = vld [vmem:[#allocation23_spill] sm:$0xff] }
  0xf7   : > { %2411 = vmatpush.xpose.msk.msrb.mxu3 %vm308_vm0, %v2792_v17  ;;  %v3757_v17 = vld [vmem:[#allocation24_spill] sm:$0xff] }
  0xf8   : > { %2328 = vmatpush.xpose.msk.msrb.mxu0 %vm308_vm0, %v3752_v8 }
  0xf9   : > { %2345 = vmatpush.xpose.msk.msrb.mxu1 %vm308_vm0, %v3753_v9 }
  0xfa   : > { %2395 = vmatpush.xpose.msk.msrb.mxu2 %vm308_vm0, %v2809_v20  ;;  %v3758_v20 = vld [vmem:[#allocation25_spill] sm:$0xff] }
  0xfb   : > { %2412 = vmatpush.xpose.msk.msrb.mxu3 %vm308_vm0, %v2812_v21  ;;  %v3759_v21 = vld [vmem:[#allocation26_spill] sm:$0xff] }
  0xfc   : > { %2329 = vmatpush.xpose.msk.msrb.mxu0 %vm308_vm0, %v3754_v12 }
  0xfd   : > { %2346 = vmatpush.xpose.msk.msrb.mxu1 %vm308_vm0, %v3755_v13 }
  0xfe   : > { %2396 = vmatpush.xpose.msk.msrb.mxu2 %vm308_vm0, %v2829_v24  ;;  %v3760_v24 = vld [vmem:[#allocation27_spill] sm:$0xff] }
  0xff   : > { %2413 = vmatpush.xpose.msk.msrb.mxu3 %vm308_vm0, %v2832_v25  ;;  %v3761_v25 = vld [vmem:[#allocation28_spill] sm:$0xff] }
 0x100   : > { %2330 = vmatpush.xpose.msk.msrb.mxu0 %vm308_vm0, %v3756_v16 }
 0x101   : > { %2347 = vmatpush.xpose.msk.msrb.mxu1 %vm308_vm0, %v3757_v17 }
 0x102   : > { %2397 = vmatpush.xpose.msk.msrb.mxu2 %vm308_vm0, %v2849_v28  ;;  %v3762_v28 = vld [vmem:[#allocation29_spill] sm:$0xff] }
 0x103   : > { %2414 = vmatpush.xpose.msk.msrb.mxu3 %vm308_vm0, %v2852_v29  ;;  %v3763_v29 = vld [vmem:[#allocation30_spill] sm:$0xff] }
 0x104   : > { %2331 = vmatpush.xpose.msk.msrb.mxu0 %vm308_vm0, %v3758_v20 }
 0x105   : > { %2348 = vmatpush.xpose.msk.msrb.mxu1 %vm308_vm0, %v3759_v21 }
 0x106   : > { %2398 = vmatpush.xpose.msk.msrb.mxu2 %vm308_vm0, %v2869_v32  ;;  %v2451_v32 = vld [vmem:[%s2705_s6 + $0x1a2] sm:$0xff] }
 0x107   : > { %2415 = vmatpush.xpose.msk.msrb.mxu3 %vm308_vm0, %v2872_v33  ;;  %v3764_v33 = vld [vmem:[#allocation31_spill] sm:$0xff] }
 0x108   : > { %2332 = vmatpush.xpose.msk.msrb.mxu0 %vm308_vm0, %v3760_v24 }
 0x109   : > { %2349 = vmatpush.xpose.msk.msrb.mxu1 %vm308_vm0, %v3761_v25 }
 0x10a   : > { %2399 = vmatpush.xpose.msk.msrb.mxu2 %vm308_vm0, %v2889_v36  ;;  %v3765_v36 = vld [vmem:[#allocation32_spill] sm:$0xff] }
 0x10b   : > { %2416 = vmatpush.xpose.msk.msrb.mxu3 %vm308_vm0, %v2892_v37  ;;  %v2318_v37 = vld [vmem:[%s3655_s1 + $0x30] sm:$0xff] }
 0x10c   : > { %2333 = vmatpush.xpose.msk.msrb.mxu0 %vm308_vm0, %v3762_v28 }
 0x10d   : > { %2350 = vmatpush.xpose.msk.msrb.mxu1 %vm308_vm0, %v3763_v29 }
 0x10e   : > { %2400 = vmatpush.xpose.msk.msrb.mxu2 %vm308_vm0, %v2909_v40  ;;  %v2385_v40 = vld [vmem:[%s3655_s1 + $0x38] sm:$0xff] }
 0x10f   : > { %2417 = vmatpush.xpose.msk.msrb.mxu3 %vm308_vm0, %v2912_v41  ;;  %v2450_v41 = vld [vmem:[%s2705_s6 + $0x19a] sm:$0xff] }
 0x110   : > { %2334 = vmatpush.xpose.msk.msrb.mxu0 %vm308_vm0, %v3764_v33 }
 0x111   : > { %2351 = vmatpush.xpose.msk.msrb.mxu1 %vm308_vm0, %v3765_v36 }
 0x112   : > { %2401 = vmatpush.xpose.msk.msrb.mxu2 %vm308_vm0, %v2929_v44 }
 0x113   : > { %2418 = vmatpush.xpose.msk.msrb.mxu3 %vm308_vm0, %v2932_v45  ;;  %2335 = vmatmul.msk.f32.vlgmr.msrb.gmra.mxu0 %vm308_vm0, %v2318_v37 }
 0x114   : > { %2453 = vmatpush.xpose.msk.msra.mxu0 %vm308_vm0, %v3204_v35  ;;  %2352 = vmatmul.msk.f32.vlgmr.msrb.gmra.mxu1 %vm308_vm0, %v2318_v37 }
 0x115   : > { %2470 = vmatpush.xpose.msk.msra.mxu1 %vm308_vm0, %v2451_v32  ;;  %2402 = vmatmul.msk.f32.vlgmr.msrb.gmra.mxu2 %vm308_vm0, %v2385_v40 }
 0x116   : > { %2419 = vmatmul.msk.f32.vlgmr.msrb.gmra.mxu3 %vm308_vm0, %v2385_v40 }
 0x118   : > { %2454 = vmatpush.xpose.msk.msra.mxu0 %vm308_vm0, %v3218_v38 }
 0x119   : > { %2471 = vmatpush.xpose.msk.msra.mxu1 %vm308_vm0, %v2450_v41 }
 0x11c   : > { %2455 = vmatpush.xpose.msk.msra.mxu0 %vm308_vm0, %v3230_v18  ;;  %v425_v18 = vpop.f32.mrf.mxu0 }
 0x11d   : > { %2472 = vmatpush.xpose.msk.msra.mxu1 %vm308_vm0, %v3250_v42 }
 0x120   : > { %2456 = vmatpush.xpose.msk.msra.mxu0 %vm308_vm0, %v3241_v46 }
 0x121   : > { %2473 = vmatpush.xpose.msk.msra.mxu1 %vm308_vm0, %v3276_v14  ;;  %v1814_v14 = vld [vmem:[%s3656_s2] sm:$0xff] }
 0x124   : > { %2457 = vmatpush.xpose.msk.msra.mxu0 %vm308_vm0, %v3011_v53  ;;  %v737_v35 = vpop.f32.mrf.mxu0 }
 0x125   : > { %2474 = vmatpush.xpose.msk.msra.mxu1 %vm308_vm0, %v3014_v56 }
 0x128   : > { %2458 = vmatpush.xpose.msk.msra.mxu0 %vm308_vm0, %v3034_v60 }
 0x129   : > { %2475 = vmatpush.xpose.msk.msra.mxu1 %vm308_vm0, %v3037_v62 }
 0x12c   : > { %2459 = vmatpush.xpose.msk.msra.mxu0 %vm308_vm0, %v3051_v58 }
 0x12d   : > { %2476 = vmatpush.xpose.msk.msra.mxu1 %vm308_vm0, %v3054_v59 }
 0x130   : > { %2460 = vmatpush.xpose.msk.msra.mxu0 %vm308_vm0, %v3065_v63 }
 0x131   : > { %2477 = vmatpush.xpose.msk.msra.mxu1 %vm308_vm0, %v3068_v52 }
 0x134   : > { %2461 = vmatpush.xpose.msk.msra.mxu0 %vm308_vm0, %v3079_v2  ;;  %v2629_v2 = vmov 0  }
 0x135   : > { %2478 = vmatpush.xpose.msk.msra.mxu1 %vm308_vm0, %v3082_v3  ;;  %2553 = vset.pattern.permute.xlu0 %v2629_v2  ;;  %v3766_v3 = vld [vmem:[#allocation41_spill] sm:$0xff] }
 0x136   : > { %1817 = vperm.xlu0 %2553, %v1814_v14  }
 0x138   : > { %2462 = vmatpush.xpose.msk.msra.mxu0 %vm308_vm0, %v3093_v6  ;;  %v3767_v6 = vld [vmem:[#allocation42_spill] sm:$0xff] }
 0x139   : > { %2479 = vmatpush.xpose.msk.msra.mxu1 %vm308_vm0, %v3096_v49 }
 0x13c   : > { %2463 = vmatpush.xpose.msk.msra.mxu0 %vm308_vm0, %v3103_v7  ;;  %v3768_v7 = vld [vmem:[#allocation43_spill] sm:$0xff] }
 0x13d   : > { %2480 = vmatpush.xpose.msk.msra.mxu1 %vm308_vm0, %v3110_v11  ;;  %v3769_v11 = vld [vmem:[#allocation44_spill] sm:$0xff] }
 0x140   : > { %2464 = vmatpush.xpose.msk.msra.mxu0 %vm308_vm0, %v3131_v15  ;;  %v2452_v15 = vld [vmem:[%s3655_s1 + $0x40] sm:$0xff] }
 0x141   : > { %2481 = vmatpush.xpose.msk.msra.mxu1 %vm308_vm0, %v3134_v10 }
 0x144   : > { %2465 = vmatpush.xpose.msk.msra.mxu0 %vm308_vm0, %v3145_v48 }
 0x145   : > { %2482 = vmatpush.xpose.msk.msra.mxu1 %vm308_vm0, %v3148_v19  ;;  %v445_v19 = vpop.f32.mrf.mxu1 }
 0x148   : > { %2466 = vmatpush.xpose.msk.msra.mxu0 %vm308_vm0, %v3159_v22  ;;  %v564_v22 = vpop.f32.mrf.mxu2 }
 0x149   : > { %2483 = vmatpush.xpose.msk.msra.mxu1 %vm308_vm0, %v3162_v23  ;;  %v584_v23 = vpop.f32.mrf.mxu3  ;;  %v565_v52 = vadd.f32 %v564_v22, %v425_v18 }
 0x14a   : > { %v585_v53 = vadd.f32 %v584_v23, %v445_v19 }
 0x14b   : > { %v760_v56 = vadd.f32 %v737_v35, %v565_v52 }
 0x14c   : > { %2467 = vmatpush.xpose.msk.msra.mxu0 %vm308_vm0, %v3766_v3 }
 0x14d   : > { %2484 = vmatpush.xpose.msk.msra.mxu1 %vm308_vm0, %v3767_v6  ;;  %v757_v38 = vpop.f32.mrf.mxu1 }
 0x14e   : > { %v761_v58 = vadd.f32 %v757_v38, %v585_v53 }
 0x150   : > { %2468 = vmatpush.xpose.msk.msra.mxu0 %vm308_vm0, %v3768_v7  ;;  %v913_v44 = vpop.f32.mrf.mxu2  ;;  %v1088_v46 = vpop.f32.mrf.mxu0 }
 0x151   : > { %2485 = vmatpush.xpose.msk.msra.mxu1 %vm308_vm0, %v3769_v11  ;;  %v933_v45 = vpop.f32.mrf.mxu3  ;;  %v936_v60 = vadd.f32 %v913_v44, %v760_v56 }
 0x152   : > { %v937_v62 = vadd.f32 %v933_v45, %v761_v58 }
 0x153   : > { %2469 = vmatmul.msk.f32.vlgmr.msra.gmra.mxu0 %vm308_vm0, %v2452_v15  ;;  %v1111_v42 = vadd.f32 %v1088_v46, %v936_v60 }
 0x154   : > { %2486 = vmatmul.msk.f32.vlgmr.msra.gmra.mxu1 %vm308_vm0, %v2452_v15 }
 0x155   : > { %v1108_v49 = vpop.f32.mrf.mxu1 }
 0x156   : > { %v1112_v34 = vadd.f32 %v1108_v49, %v937_v62 }
 0x158   : > { %v1263_v59 = vpop.f32.mrf.mxu2 }
 0x159   : > { %v1283_v63 = vpop.f32.mrf.mxu3  ;;  %v1286_v26 = vadd.f32 %v1263_v59, %v1111_v42 }
 0x15a   : > { %v1287_v39 = vadd.f32 %v1283_v63, %v1112_v34 }
 0x190   : > { %v1439_v10 = vpop.f32.mrf.mxu0 }
 0x191   : > { %v1459_v48 = vpop.f32.mrf.mxu1  ;;  %v1462_v31 = vadd.f32 %v1439_v10, %v1286_v26 }
 0x192   : > { %v1463_v51 = vadd.f32 %v1459_v48, %v1287_v39 }
 0x198   : > { %v1614_v50 = vpop.f32.mrf.mxu2 }
 0x199   : > { %v1634_v27 = vpop.f32.mrf.mxu3  ;;  %v1637_v55 = vadd.f32 %v1614_v50, %v1462_v31 }
 0x19a   : > { %v1638_v30 = vadd.f32 %v1634_v27, %v1463_v51 }
 0x1a8   : > { %v1818_v43 = vpop.permute.xlu0 %1817 }
 0x1d0   : > { %v1789_v47 = vpop.f32.mrf.mxu0 }
 0x1d1   : > { %v1809_v57 = vpop.f32.mrf.mxu1  ;;  %v1812_v61 = vadd.f32 %v1789_v47, %v1637_v55 }
 0x1d2   : > { %v1813_v54 = vadd.f32 %v1809_v57, %v1638_v30  ;;  %1830 = sbr.rel (%p2489_p7) target bundleno = 474 (0x1da), region = 48 }
 0x1d3   : > { %v1820_v0 = vadd.f32 %v1818_v43, %v1812_v61 }
 0x1d4   : > { %v1821_v1 = vadd.f32 %v1818_v43, %v1813_v54 }
 0x1d5   : > { %1825 = vst [vmem:[%s1824_s11] sm:$0xff] %v1820_v0 }
 0x1d6   : > { %1826 = vst [vmem:[%s1824_s11 + $0x8] sm:$0xff] %v1821_v1 }
 0x1d7   : > { %vm1831_vm1 = vcmask 7168   ;;  %v2630_v4 = vmov 0.0  }
 0x1d8   : > { %1832 = vst.msk [vmem:[#allocation2] sm:$0xff] %vm1831_vm1, %v2630_v4 }
 0x1d9   : > { %1833 = vst.msk [vmem:[#allocation3] sm:$0xff] %vm1831_vm1, %v2630_v4 }
 0x1da PF: > { %v1835_v5 = vadd.f32 %v1813_v54, %v1812_v61  ;;  %v1842_v8 = vmul.f32 %v1812_v61, %v1812_v61  ;;  %v1843_v9 = vmul.f32 %v1813_v54, %v1813_v54  ;;  %vm1839_vm2 = vcmask 7168  }
 0x1dc   : > { %1836 = vadd.xlane.f32.xlu0 %v1835_v5  ;;  %v1844_v12 = vadd.f32 %v1843_v9, %v1842_v8 }
 0x1df   : > { %v1834_v13 = vld [vmem:[#allocation2] sm:$0xff] }
 0x1e0   : > { %v1841_v20 = vld [vmem:[#allocation3] sm:$0xff] }
 0x1e4   : > { %1845 = vadd.xlane.f32.xlu0 %v1844_v12 }
 0x24f   : > { %v1837_v16 = vpop.xlane.xlu0 %1836 }
 0x250   : > { %v1838_v17 = vadd.f32 %v1837_v16, %v1834_v13 }
 0x252   : > { %1840 = vst.msk [vmem:[#allocation2] sm:$0xff] %vm1839_vm2, %v1838_v17 }
 0x257   : > { %v1846_v21 = vpop.xlane.xlu0 %1845 }
 0x258   : > { %v1847_v24 = vadd.f32 %v1846_v21, %v1841_v20 }
 0x25a   : > { %1848 = vst.msk [vmem:[#allocation3] sm:$0xff] %vm1839_vm2, %v1847_v24 }
 0x25b PF: > { %p2490_p8 = scmp.ne.s32.totalorder %s2615_s19, 1 }
 0x25c   : > { %p2491_p9 = scmp.ne.s32.totalorder (!%p2490_p8), %s2611_s18, 0 }
 0x25d   : > { %1852 = sbr.rel (%p2490_p8) target bundleno = 781 (0x30d), region = 52 }
 0x262   : > { %1856 = sbr.rel (%p2491_p9) target bundleno = 649 (0x289), region = 56 }
 0x267   : > { %v1857_v25 = vld [vmem:[#allocation2] sm:$0xff]  ;;  %v1859_v28 = vld [vmem:[#allocation3] sm:$0xff]  ;;  %vm1876_vm6 = vcmask 7168  }
 0x268   : > { %v1858_v29 = vmul.f32 0.001953125, %v1857_v25  ;;  %v1860_v32 = vmul.f32 0.001953125, %v1859_v28  ;;  %v1879_v6 = vld [vmem:[%s3656_s2] sm:$0xff] }
 0x269   : > { %v1863_v7 = vld [vmem:[%s3657_s3] sm:$0xff] }
 0x26a   : > { %v1861_v33 = vmul.f32 %v1858_v29, %v1858_v29  ;;  %v1880_v15 = vadd.f32 %v1879_v6, %v1858_v29  ;;  %v1878_v22 = vld [vmem:[%s3658_s4] sm:$0xff] }
 0x26c   : > { %v1862_v36 = vsub.f32 %v1860_v32, %v1861_v33 }
 0x26e   : > { %v1864_v37 = vadd.f32 1e-05, %v1862_v36 }
 0x270   : > { %2554 = vrsqrt.f32 %v1864_v37  ;;  %vm1871_vm3 = vweird.f32 %v1864_v37 }
 0x276   : > { %v2555_v40 = vpop.eup %2554 }
 0x277   : > { %v1866_v41 = vmul.f32 %v2555_v40, %v1864_v37  ;;  %vm1872_vm4 = vweird.f32 %v2555_v40 }
 0x278   : > { %vm1873_vm5 = vmor %vm1871_vm3, %vm1872_vm4 }
 0x279   : > { %v1867_v14 = vmul.f32 %v2555_v40, %v1866_v41 }
 0x27b   : > { %v1868_v2 = vmul.f32 0.5, %v1867_v14 }
 0x27d   : > { %v1869_v3 = vsub.f32 1.5, %v1868_v2 }
 0x27f   : > { %v1870_v11 = vmul.f32 %v2555_v40, %v1869_v3 }
 0x281   : > { %v1874_v18 = vsel %vm1873_vm5, %v2555_v40, %v1870_v11 }
 0x282   : > { %v1875_v19 = vmul.f32 %v1874_v18, %v1863_v7 }
 0x284   : > { %1877 = vst.msk [vmem:[#allocation4] sm:$0xff] %vm1876_vm6, %v1875_v19  ;;  %v1881_v23 = vmul.f32 %v1880_v15, %v1875_v19 }
 0x286   : > { %v1882_v35 = vsub.f32 %v1878_v22, %v1881_v23 }
 0x288   : > { %1883 = vst.msk [vmem:[#allocation5] sm:$0xff] %vm1876_vm6, %v1882_v35 }
 0x289 PF: > { %v2631_v44 = vmov 0   ;;  %s2499_s17 = sshll.u32 %s2611_s18, 4 }
 0x28a   : > { %2556 = vset.pattern.permute.xlu0 %v2631_v44  ;;  %s1886_s26 = scalar_lea.vmem [#allocation6], %s2499_s17 }
 0x28b   : > { %v1889_v38 = vld [vmem:[#allocation4] sm:$0xff]  ;;  %v1887_v49 = vld [vmem:[%s1886_s26] sm:$0xff]  ;;  %v1888_v52 = vld [vmem:[%s1886_s26 + $0x8] sm:$0xff] }
 0x28c   : > { %1892 = vperm.xlu0 %2556, %v1889_v38  }
 0x28f   : > { %v1897_v45 = vld [vmem:[#allocation5] sm:$0xff] }
 0x294   : > { %1900 = vperm.xlu0 %2556, %v1897_v45  }
 0x2fe   : > { %v1893_v46 = vpop.permute.xlu0 %1892 }
 0x2ff   : > { %v1895_v53 = vmul.f32 %v1893_v46, %v1887_v49  ;;  %v1896_v59 = vmul.f32 %v1893_v46, %v1888_v52 }
 0x306   : > { %v1901_v63 = vpop.permute.xlu0 %1900 }
 0x307   : > { %v1903_v56 = vadd.f32 %v1901_v63, %v1895_v53  ;;  %v1904_v58 = vadd.f32 %v1901_v63, %v1896_v59 }
 0x309   : > { %v1905_v60 = vmax.f32 %v1903_v56, 0.0  ;;  %v1906_v62 = vmax.f32 %v1904_v58, 0.0 }
 0x30b   : > { %1907 = vst [vmem:[%s1886_s26] sm:$0xff] %v1905_v60 }
 0x30c   : > { %1908 = vst [vmem:[%s1886_s26 + $0x8] sm:$0xff] %v1906_v62 }
 0x30d PF: > { %p2505_p10 = scmp.eq.s32.totalorder %s1975_s23, 3  ;;  %s1916_s18 = sshll.u32 %s3659_s5, 4  ;;  %s1917_s18 = int_to_ptr.hbm [resolvable:$true] %s1916_s18 }
 0x30e   : > { %s2632_s29 = smov [#allocation6]   ;;  %s2633_s6 = smov 256  }
 0x30f   : > { %s1914_s30 = sshll.u32 %s2632_s29, 4  ;;  %s2634_s7 = smov 16   ;;  %s1915_s30 = int_to_ptr.vmem [resolvable:$true] %s1914_s30 }
 0x310   : > { %2502 = dma.vmem_to_hbm [thread:$0]  (%p2505_p10), %s1915_s30, 512, %s1917_s18, [#allocation7], %s2633_s6, %s2633_s6, %s2634_s7  }
 0x311   : > { %2606 = dma.done.wait (%p2505_p10), [#allocation7], 512  }
 0x312   : > { %2608 = vsyncadd (%p2505_p10), [#allocation7], 4294966784 }
 0x313 PF: > { %s16_s22 = sadd.s32 1, %s2627_s22   ;;  %s3770_s18 = smov %s2619_s20 }
 0x314   : > { %p13_p11 = scmp.ge.s32.totalorder %s16_s22, 6   ;;  %s3771_s19 = smov %s2623_s21 }
 0x315   : > { %s3772_s20 = smov %s3775_s24  ;;  %s3773_s21 = smov %s3779_s25 }
 0x316   :  { %15 = sbr.rel (!%p13_p11) target bundleno = 3 (0x3), region = 95 }
 0x31b   :  { %1933 = vsyncpa [#allocation7], 1 }
 0x31c   :  { %1935 = vsyncpa [#allocation7 + $0x1], 1 }

</bundles_post_ra>
